<compile_context>
chip_gen: v5e
topology: v5e:2x2
jax: 0.10.0
libtpu: 0.0.40
codegen_flags: <defaults>
</compile_context>

<pallas_src>
import functools

import jax
import jax.numpy as jnp
from jax.experimental import pallas as pl
from jax.experimental.pallas import tpu as pltpu


# ----------------------------- Pallas matmul ---------------------------------

def _matmul_kernel(a_ref, b_ref, o_ref, acc_ref):
    """bf16 x bf16 tiles on the MXU, f32 accumulation, cast out on last K step."""
    @pl.when(pl.program_id(2) == 0)
    def _():
        acc_ref[...] = jnp.zeros_like(acc_ref)

    acc_ref[...] += jnp.dot(a_ref[...], b_ref[...],
                            preferred_element_type=jnp.float32)

    @pl.when(pl.program_id(2) == pl.num_programs(2) - 1)
    def _():
        o_ref[...] = acc_ref[...].astype(o_ref.dtype)


def _round_up(x, m):
    return ((x + m - 1) // m) * m


def _pick_tile(dim, pref, step):
    """Tile size for one matmul dim.

    - dim <= pref: use the full dim (legal BlockSpec, zero padding).
    - otherwise: largest multiple-of-`step` candidate <= pref that divides dim
      exactly (zero padding); if none divides, the candidate with least padding.
    """
    if dim <= pref:
        return dim
    best, best_waste = None, None
    for cand in range(pref, step - 1, -step):
        waste = (-dim) % cand
        if waste == 0:
            return cand
        if best_waste is None or waste < best_waste:
            best, best_waste = cand, waste
    return best


def pallas_matmul(a, b, out_dtype=jnp.bfloat16, tm=512, tn=512, tk=512):
    """a: (M, K), b: (K, N) -> (M, N). Operands fed to the MXU as bf16."""
    M, K = a.shape
    K2, N = b.shape
    assert K == K2
    a = a.astype(jnp.bfloat16)
    b = b.astype(jnp.bfloat16)

    tm_e = _pick_tile(M, tm, 8)      # second-to-last dim of A / out: x8 or full
    tn_e = _pick_tile(N, tn, 128)    # last dim of B / out: x128 or full
    tk_e = _pick_tile(K, tk, 128)    # last dim of A (x128 or full); 2nd-to-last of B

    Mp, Np, Kp = _round_up(M, tm_e), _round_up(N, tn_e), _round_up(K, tk_e)
    if (Mp, Kp) != (M, K):
        a = jnp.pad(a, ((0, Mp - M), (0, Kp - K)))
    if (Kp, Np) != (K, N):
        b = jnp.pad(b, ((0, Kp - K), (0, Np - N)))

    out = pl.pallas_call(
        _matmul_kernel,
        out_shape=jax.ShapeDtypeStruct((Mp, Np), out_dtype),
        grid=(Mp // tm_e, Np // tn_e, Kp // tk_e),
        in_specs=[pl.BlockSpec((tm_e, tk_e), lambda i, j, k: (i, k)),
                  pl.BlockSpec((tk_e, tn_e), lambda i, j, k: (k, j))],
        out_specs=pl.BlockSpec((tm_e, tn_e), lambda i, j, k: (i, j)),
        scratch_shapes=[pltpu.VMEM((tm_e, tn_e), jnp.float32)],
        compiler_params=pltpu.CompilerParams(
            dimension_semantics=("parallel", "parallel", "arbitrary")),
    )(a, b)

    if (Mp, Np) != (M, N):
        out = out[:M, :N]
    return out


# ------------------------ Pallas GroupNorm (+fused add/ReLU) ------------------

def _gn_kernel(x_ref, *refs, eps, count, relu, grouped, has_residual):
    """GroupNorm over one sample block (1, HW, C).

    grouped=False  -> groups == C (gn_proj): per-channel stats, no matmul at all.
    grouped=True   -> per-group stats via small (C,G)/(G,C) membership matrices.
    has_residual   -> fuse `relu(y + residual)` epilogue (bottleneck tail).
    """
    idx = 0
    res_ref = None
    if has_residual:
        res_ref = refs[idx]; idx += 1
    gamma_ref = refs[idx]; beta_ref = refs[idx + 1]; idx += 2
    if grouped:
        c2g_ref = refs[idx]; g2c_ref = refs[idx + 1]; idx += 2
    o_ref = refs[idx]

    x = x_ref[0].astype(jnp.float32)                       # (HW, C)
    s = jnp.sum(x, axis=0, keepdims=True)                  # (1, C)
    ss = jnp.sum(x * x, axis=0, keepdims=True)             # (1, C)

    if grouped:
        s = jnp.dot(s, c2g_ref[...], preferred_element_type=jnp.float32)    # (1, G)
        ss = jnp.dot(ss, c2g_ref[...], preferred_element_type=jnp.float32)  # (1, G)

    inv_count = 1.0 / count
    mean = s * inv_count
    var = ss * inv_count - mean * mean

    if grouped:
        mean = jnp.dot(mean, g2c_ref[...], preferred_element_type=jnp.float32)  # (1, C)
        var = jnp.dot(var, g2c_ref[...], preferred_element_type=jnp.float32)    # (1, C)

    inv = jax.lax.rsqrt(var + eps)
    y = (x - mean) * inv * gamma_ref[...] + beta_ref[...]
    if has_residual:
        y = y + res_ref[0].astype(jnp.float32)
    if relu:
        y = jnp.maximum(y, 0.0)
    o_ref[0] = y.astype(o_ref.dtype)


def group_norm(x, gamma, beta, groups, eps, relu=False, residual=None):
    """x: (N, H, W, C) NHWC. PyTorch nn.GroupNorm semantics (biased variance).

    If `residual` is given, computes relu(GN(x) + residual) fused in one kernel.
    """
    # TODO(synk): tile the HW axis with a two-pass reduction for real TransUNet
    # resolutions; one (1, HW, C) block per sample is plenty for these shapes.
    N, H, W, C = x.shape
    assert C % groups == 0
    HW = H * W
    cg = C // groups
    count = float(HW * cg)
    grouped = groups != C
    has_residual = residual is not None
    dtype = x.dtype

    args = [x.reshape(N, HW, C)]
    in_specs = [pl.BlockSpec((1, HW, C), lambda n: (n, 0, 0))]
    if has_residual:
        args.append(residual.reshape(N, HW, C).astype(dtype))
        in_specs.append(pl.BlockSpec((1, HW, C), lambda n: (n, 0, 0)))
    args += [gamma.reshape(1, C).astype(jnp.float32),
             beta.reshape(1, C).astype(jnp.float32)]
    in_specs += [pl.BlockSpec((1, C), lambda n: (0, 0)),
                 pl.BlockSpec((1, C), lambda n: (0, 0))]
    if grouped:
        # channel->group and group->channel membership matrices (small: C*G floats).
        c2g = jnp.kron(jnp.eye(groups, dtype=jnp.float32),
                       jnp.ones((cg, 1), jnp.float32))          # (C, G)
        g2c = jnp.kron(jnp.eye(groups, dtype=jnp.float32),
                       jnp.ones((1, cg), jnp.float32))          # (G, C)
        args += [c2g, g2c]
        in_specs += [pl.BlockSpec((C, groups), lambda n: (0, 0)),
                     pl.BlockSpec((groups, C), lambda n: (0, 0))]

    out = pl.pallas_call(
        functools.partial(_gn_kernel, eps=eps, count=count, relu=relu,
                          grouped=grouped, has_residual=has_residual),
        out_shape=jax.ShapeDtypeStruct((N, HW, C), dtype),
        grid=(N,),
        in_specs=in_specs,
        out_specs=pl.BlockSpec((1, HW, C), lambda n: (n, 0, 0)),
        compiler_params=pltpu.CompilerParams(
            dimension_semantics=("parallel",)),
    )(*args)
    return out.reshape(N, H, W, C)


# ------------------------------ JAX glue -------------------------------------

def _im2col(x, kh, kw, stride, pad):
    """x: (N, H, W, C) -> patches (N, Ho, Wo, kh*kw*C), (kh, kw, C) flattened order."""
    # TODO(synk): stream the kh*kw taps through the matmul K grid (pl.Element offsets)
    # instead of materializing the patch blow-up in HBM for 3x3 / 7x7 convs.
    if pad > 0:
        x = jnp.pad(x, ((0, 0), (pad, pad), (pad, pad), (0, 0)))
    N, H, W, C = x.shape
    Ho = (H - kh) // stride + 1
    Wo = (W - kw) // stride + 1
    cols = []
    for i in range(kh):
        for j in range(kw):
            cols.append(x[:, i:i + stride * Ho:stride, j:j + stride * Wo:stride, :])
    return jnp.concatenate(cols, axis=-1)


def std_conv2d(x, w, stride, pad):
    """StdConv2d: weight-standardized conv. x: NHWC (bf16), w: (Cout, Cin, KH, KW)."""
    w = w.astype(jnp.float32)
    m = jnp.mean(w, axis=(1, 2, 3), keepdims=True)
    v = jnp.var(w, axis=(1, 2, 3), keepdims=True)          # biased (unbiased=False)
    w = (w - m) * jax.lax.rsqrt(v + 1e-5)
    Cout, Cin, KH, KW = w.shape
    wmat = jnp.transpose(w, (2, 3, 1, 0)).reshape(KH * KW * Cin, Cout).astype(jnp.bfloat16)

    if KH == 1 and KW == 1 and pad == 0:
        xs = x[:, ::stride, ::stride, :] if stride > 1 else x
        N, Ho, Wo, _ = xs.shape
        out = pallas_matmul(xs.reshape(N * Ho * Wo, Cin).astype(jnp.bfloat16), wmat)
        return out.reshape(N, Ho, Wo, Cout)

    patches = _im2col(x, KH, KW, stride, pad)
    N, Ho, Wo, Kdim = patches.shape
    out = pallas_matmul(patches.reshape(N * Ho * Wo, Kdim).astype(jnp.bfloat16), wmat)
    return out.reshape(N, Ho, Wo, Cout)


def max_pool_3x3_s2(x):
    """MaxPool2d(kernel_size=3, stride=2, padding=0). Plain-JAX glue."""
    # TODO(synk): could be a Pallas kernel with strided pl.ds loads; kept in JAX glue.
    N, H, W, C = x.shape
    Ho = (H - 3) // 2 + 1
    Wo = (W - 3) // 2 + 1
    out = x[:, 0:2 * Ho:2, 0:2 * Wo:2, :]
    for i in range(3):
        for j in range(3):
            if i == 0 and j == 0:
                continue
            out = jnp.maximum(out, x[:, i:i + 2 * Ho:2, j:j + 2 * Wo:2, :])
    return out


# -------------------------- model: parameters & forward ----------------------

def _key_iter(key):
    while True:
        key, sub = jax.random.split(key)
        yield sub


def init_resnet_params(key, in_channels, block_units, width_factor):
    keys = _key_iter(key)
    width = int(64 * width_factor)

    def conv_w(cout, cin, k):
        return jax.random.normal(next(keys), (cout, cin, k, k), jnp.float32) * 0.1

    def gn(c):
        return jnp.ones((c,), jnp.float32), jnp.zeros((c,), jnp.float32)

    def unit(cin, cout, cmid, stride):
        p = {"stride": stride, "cout": cout}
        p["conv1_w"] = conv_w(cmid, cin, 1)
        p["gn1_g"], p["gn1_b"] = gn(cmid)
        p["conv2_w"] = conv_w(cmid, cmid, 3)
        p["gn2_g"], p["gn2_b"] = gn(cmid)
        p["conv3_w"] = conv_w(cout, cmid, 1)
        p["gn3_g"], p["gn3_b"] = gn(cout)
        if stride != 1 or cin != cout:
            p["down_w"] = conv_w(cout, cin, 1)
            p["gnp_g"], p["gnp_b"] = gn(cout)
        return p

    params = {"width": width,
              "root": {"conv_w": conv_w(width, in_channels, 7)}}
    params["root"]["gn_g"], params["root"]["gn_b"] = gn(width)

    body = []
    b1 = [unit(width, width * 4, width, 1)]
    b1 += [unit(width * 4, width * 4, width, 1) for _ in range(2, block_units[0] + 1)]
    body.append(b1)
    b2 = [unit(width * 4, width * 8, width * 2, 2)]
    b2 += [unit(width * 8, width * 8, width * 2, 1) for _ in range(2, block_units[1] + 1)]
    body.append(b2)
    b3 = [unit(width * 8, width * 16, width * 4, 2)]
    b3 += [unit(width * 16, width * 16, width * 4, 1) for _ in range(2, block_units[2] + 1)]
    body.append(b3)
    params["body"] = body
    return params


def preact_bottleneck(x, p):
    stride = p["stride"]
    if "down_w" in p:
        residual = std_conv2d(x, p["down_w"], stride=stride, pad=0)
        # gn_proj = nn.GroupNorm(cout, cout): one group per channel, default eps=1e-5.
        residual = group_norm(residual, p["gnp_g"], p["gnp_b"],
                              groups=p["cout"], eps=1e-5, relu=False)
    else:
        residual = x
    y = std_conv2d(x, p["conv1_w"], stride=1, pad=0)
    y = group_norm(y, p["gn1_g"], p["gn1_b"], groups=32, eps=1e-6, relu=True)
    y = std_conv2d(y, p["conv2_w"], stride=stride, pad=1)
    y = group_norm(y, p["gn2_g"], p["gn2_b"], groups=32, eps=1e-6, relu=True)
    y = std_conv2d(y, p["conv3_w"], stride=1, pad=0)
    # Fused: relu(gn3(conv3(y)) + residual) in one GroupNorm kernel.
    return group_norm(y, p["gn3_g"], p["gn3_b"], groups=32, eps=1e-6,
                      relu=True, residual=residual)


def resnet_v2_forward(x_nchw, params):
    """Matches ResNetV2.forward: returns (x, features[::-1]) in NCHW (f32)."""
    b, c, in_size, _ = x_nchw.shape
    # Carry activations in bf16 NHWC between kernels; GN math is f32 inside kernels.
    x = jnp.transpose(x_nchw, (0, 2, 3, 1)).astype(jnp.bfloat16)

    # root: StdConv2d(k=7, s=2, p=3) -> GroupNorm(32) -> ReLU
    x = std_conv2d(x, params["root"]["conv_w"], stride=2, pad=3)
    x = group_norm(x, params["root"]["gn_g"], params["root"]["gn_b"],
                   groups=32, eps=1e-6, relu=True)
    features = [x]

    x = max_pool_3x3_s2(x)

    body = params["body"]
    for i in range(len(body) - 1):
        for unit_p in body[i]:
            x = preact_bottleneck(x, unit_p)
        right_size = int(in_size / 4 / (i + 1))
        if x.shape[1] != right_size:
            pad = right_size - x.shape[1]
            assert 0 < pad < 3, f"x {x.shape} should {right_size}"
            feat = jnp.zeros((b, right_size, right_size, x.shape[3]), x.dtype)
            feat = feat.at[:, :x.shape[1], :x.shape[2], :].set(x)
        else:
            feat = x
        features.append(feat)

    for unit_p in body[-1]:
        x = preact_bottleneck(x, unit_p)

    x_out = jnp.transpose(x, (0, 3, 1, 2)).astype(jnp.float32)
    feats = [jnp.transpose(f, (0, 3, 1, 2)).astype(jnp.float32)
             for f in features[::-1]]
    return x_out, feats


# ----------------------------------- main ------------------------------------

if __name__ == "__main__":
    key = jax.random.PRNGKey(0)
    k_x, k_p = jax.random.split(key)

    in_channels = 3
    block_units = (1, 1, 1)
    width_factor = 0.5          # width = 32 (GroupNorm(32, .) still valid)
    batch, in_size = 2, 32

    params = init_resnet_params(k_p, in_channels, block_units, width_factor)
    x = jax.random.normal(k_x, (batch, in_channels, in_size, in_size), jnp.float32)

    out, feats = resnet_v2_forward(x, params)
    out = jax.block_until_ready(out)
    feats = [jax.block_until_ready(f) for f in feats]

    width = params["width"]
    assert out.shape == (batch, width * 16, 2, 2), out.shape
    assert feats[0].shape == (batch, width * 8, 4, 4), feats[0].shape
    assert feats[1].shape == (batch, width * 4, 8, 8), feats[1].shape
    assert feats[2].shape == (batch, width, 16, 16), feats[2].shape
    assert bool(jnp.all(jnp.isfinite(out)))

    print("KERNEL_OK")
</pallas_src>

<mosaic_0001>
module attributes {stable_mosaic.version = 11 : i64} {
  func.func @_matmul_kernel(%arg0: i32, %arg1: i32, %arg2: i32, %arg3: memref<512x147xbf16, #tpu.memory_space<vmem>>, %arg4: memref<147x32xbf16, #tpu.memory_space<vmem>>, %arg5: memref<512x32xbf16, #tpu.memory_space<vmem>>, %arg6: memref<512x32xf32, #tpu.memory_space<vmem>>) attributes {dimension_semantics = [#tpu.dimension_semantics<parallel>, #tpu.dimension_semantics<parallel>, #tpu.dimension_semantics<arbitrary>], iteration_bounds = array<i64: 1, 1, 1>, scalar_prefetch = 0 : i64, scratch_operands = 1 : i64, tpu.core_type = #tpu.core_type<tc>, window_params = [{transform_indices = @transform_0, window_bounds = array<i64: 512, 147>}, {transform_indices = @transform_1, window_bounds = array<i64: 147, 32>}, {transform_indices = @transform_2, window_bounds = array<i64: 512, 32>}]} {
    %c0_i32 = arith.constant 0 : i32
    %0 = arith.cmpi eq, %arg2, %c0_i32 : i32
    %1 = arith.extui %0 : i1 to i32
    %c0_i32_0 = arith.constant 0 : i32
    %2 = arith.cmpi ne, %1, %c0_i32_0 : i32
    scf.if %2 {
      %cst_10 = arith.constant 0.000000e+00 : f32
      %12 = vector.broadcast %cst_10 : f32 to vector<512x32xf32>
      %c0_11 = arith.constant 0 : index
      %c0_12 = arith.constant 0 : index
      %13 = vector.load %arg6[%c0_11, %c0_12] : memref<512x32xf32, #tpu.memory_space<vmem>>, vector<512x32xf32>
      tpu.vector_store %arg6[%c0_11, %c0_12], %12 {strides = array<i32>} : memref<512x32xf32, #tpu.memory_space<vmem>>, vector<512x32xf32>,
    } else {
    }
    %c0 = arith.constant 0 : index
    %c0_1 = arith.constant 0 : index
    %3 = vector.load %arg6[%c0, %c0_1] : memref<512x32xf32, #tpu.memory_space<vmem>>, vector<512x32xf32>
    %c0_2 = arith.constant 0 : index
    %c0_3 = arith.constant 0 : index
    %4 = vector.load %arg3[%c0_2, %c0_3] : memref<512x147xbf16, #tpu.memory_space<vmem>>, vector<512x147xbf16>
    %c0_4 = arith.constant 0 : index
    %c0_5 = arith.constant 0 : index
    %5 = vector.load %arg4[%c0_4, %c0_5] : memref<147x32xbf16, #tpu.memory_space<vmem>>, vector<147x32xbf16>
    %cst = arith.constant dense<0.000000e+00> : vector<512x32xf32>
    %6 = tpu.matmul %4, %5, %cst {dimension_numbers = #tpu.dot_dimension_numbers<[1], [0], [0], [1], [0, 0, 1, 1], [], []>} : vector<512x147xbf16>, vector<147x32xbf16>, vector<512x32xf32> -> vector<512x32xf32>
    %7 = arith.addf %3, %6 : vector<512x32xf32>
    %c0_6 = arith.constant 0 : index
    %c0_7 = arith.constant 0 : index
    %8 = vector.load %arg6[%c0_6, %c0_7] : memref<512x32xf32, #tpu.memory_space<vmem>>, vector<512x32xf32>
    tpu.vector_store %arg6[%c0_6, %c0_7], %7 {strides = array<i32>} : memref<512x32xf32, #tpu.memory_space<vmem>>, vector<512x32xf32>,
    %c0_i32_8 = arith.constant 0 : i32
    %9 = arith.cmpi eq, %arg2, %c0_i32_8 : i32
    %10 = arith.extui %9 : i1 to i32
    %c0_i32_9 = arith.constant 0 : i32
    %11 = arith.cmpi ne, %10, %c0_i32_9 : i32
    scf.if %11 {
      %c0_10 = arith.constant 0 : index
      %c0_11 = arith.constant 0 : index
      %12 = vector.load %arg6[%c0_10, %c0_11] : memref<512x32xf32, #tpu.memory_space<vmem>>, vector<512x32xf32>
      %13 = arith.truncf %12 : vector<512x32xf32> to vector<512x32xbf16>
      %c0_12 = arith.constant 0 : index
      %c0_13 = arith.constant 0 : index
      %14 = vector.load %arg5[%c0_12, %c0_13] : memref<512x32xbf16, #tpu.memory_space<vmem>>, vector<512x32xbf16>
      tpu.vector_store %arg5[%c0_12, %c0_13], %13 {strides = array<i32>} : memref<512x32xbf16, #tpu.memory_space<vmem>>, vector<512x32xbf16>,
    } else {
    }
    return
  }
  func.func @transform_0(%arg0: i32, %arg1: i32, %arg2: i32) -> (i32, i32) {
    %c0_i32 = arith.constant 0 : i32
    return %arg0, %arg2 : i32, i32
  }
  func.func @transform_1(%arg0: i32, %arg1: i32, %arg2: i32) -> (i32, i32) {
    %c0_i32 = arith.constant 0 : i32
    return %arg2, %arg1 : i32, i32
  }
  func.func @transform_2(%arg0: i32, %arg1: i32, %arg2: i32) -> (i32, i32) {
    %c0_i32 = arith.constant 0 : i32
    return %arg0, %arg1 : i32, i32
  }
}

</mosaic_0001>

<bundles_post_ra>
// kernel: tpu_custom_call.1
= control target key start
LH: loop header
LB: loop body
LE: loop exit
PB: predicated region body
PF: predicated region fallthrough
CT: control target
= control target key end

     0   :  { %vm670_vm0 = vcmask 1040384   ;;  %vm671_vm1 = vcmask 1041408   ;;  %v1753_v2 = vmov 65535   ;;  %vm573_vm2 = vcmask 154624   ;;  %s2745_s1 = inlined_call_operand.vmem [shape: bf16[147,32], index: 1, kind: input, shape index: {}]   ;;  %s2746_s0 = inlined_call_operand.vmem [shape: bf16[512,147], index: 0, kind: input, shape index: {}]   ;;  %s2747_s2 = inlined_call_operand.vmem [shape: bf16[512,32], index: 2, kind: output, shape index: {}]  }
   0x1   :  { %v1739_v0 = vld [vmem:[%s2745_s1 + $0x38] sm:$0xff]  ;;  %v227_v1 = vld [vmem:[%s2745_s1 + $0x48] sm:$0x3]  ;;  %v672_v3 = vsel %vm670_vm0, 4294967295, %v1753_v2  ;;  %v1738_v5 = vld [vmem:[%s2745_s1 + $0x30] sm:$0xff]  ;;  %vm16_vm3 = vcmask 261120  }
   0x2   :  { %v553_v4 = vunpack.c.l.b16 %v227_v1  ;;  %677 = vmatpush.bf16.msra.mxu0 %v1739_v0  ;;  %1741 = vmatpush.bf16.msra.mxu2 %v1739_v0  ;;  %v673_v6 = vsel %vm671_vm1, %v672_v3, 0  ;;  %v1737_v9 = vld [vmem:[%s2745_s1 + $0x28] sm:$0xff]  ;;  %v1740_v10 = vld [vmem:[%s2745_s1 + $0x40] sm:$0xff]  ;;  %v1702_v13 = vld [vmem:[%s2746_s0 + $0x114] sm:$0xf]  ;;  %vm1275_vm4 = vcmask 257024  }
   0x3   :  { %v1668_v11 = vld [vmem:[%s2746_s0 + $0x4] sm:$0xf]  ;;  %v1348_v12 = vld [vmem:[%s2746_s0 + $0x8] sm:$0xf0]  ;;  %v1484_v14 = vld [vmem:[%s2746_s0 + $0x118] sm:$0xf0] }
   0x4   :  { %v563_v7 = vpack.c.b16 %v553_v4, %v553_v4  ;;  %v1351_v15 = vor.u32 %v1668_v11, %v1348_v12  ;;  %v1736_v16 = vld [vmem:[%s2745_s1 + $0x20] sm:$0xff]  ;;  %v1487_v17 = vor.u32 %v1702_v13, %v1484_v14  ;;  %v1735_v18 = vld [vmem:[%s2745_s1 + $0x18] sm:$0xff]  ;;  %v1734_v19 = vld [vmem:[%s2745_s1 + $0x10] sm:$0xff] }
   0x5   :  { %v1733_v20 = vld [vmem:[%s2745_s1 + $0x8] sm:$0xff]  ;;  %v1670_v21 = vld [vmem:[%s2746_s0 + $0x14] sm:$0xf]  ;;  %v1356_v22 = vld [vmem:[%s2746_s0 + $0x18] sm:$0xf0] }
   0x6   :  { %v675_v8 = vand.u32 %v673_v6, %v563_v7  ;;  %678 = vmatpush.bf16.msra.mxu0 %v1738_v5  ;;  %1742 = vmatpush.bf16.msra.mxu2 %v1738_v5  ;;  %v1704_v23 = vld [vmem:[%s2746_s0 + $0x124] sm:$0xf]  ;;  %v1492_v24 = vld [vmem:[%s2746_s0 + $0x128] sm:$0xf0]  ;;  %v1359_v25 = vor.u32 %v1670_v21, %v1356_v22  ;;  %v1346_v27 = vld [vmem:[%s2746_s0] sm:$0xf] }
   0x7   :  { %v1732_v26 = vld [vmem:[%s2745_s1] sm:$0xff]  ;;  %v1669_v28 = vld [vmem:[%s2746_s0 + $0x4] sm:$0xf0]  ;;  %v1495_v31 = vor.u32 %v1704_v23, %v1492_v24  ;;  %v1364_v35 = vld [vmem:[%s2746_s0 + $0x28] sm:$0xf0] }
   0x8   :  { %852 = vmatpush.bf16.msra.mxu1 %v675_v8  ;;  %1749 = vmatpush.bf16.msra.mxu3 %v675_v8  ;;  %v1474_v29 = vld [vmem:[%s2746_s0 + $0x100] sm:$0xf]  ;;  %v1701_v30 = vld [vmem:[%s2746_s0 + $0x104] sm:$0xf0]  ;;  %v1347_v32 = vor.u32 %v1669_v28, %v1346_v27  ;;  %v1672_v34 = vld [vmem:[%s2746_s0 + $0x24] sm:$0xf] }
   0x9   :  { %v1475_v33 = vor.u32 %v1701_v30, %v1474_v29  ;;  %v1706_v36 = vld [vmem:[%s2746_s0 + $0x134] sm:$0xf]  ;;  %v1500_v37 = vld [vmem:[%s2746_s0 + $0x138] sm:$0xf0]  ;;  %v1367_v38 = vor.u32 %v1672_v34, %v1364_v35  ;;  %v1354_v39 = vld [vmem:[%s2746_s0 + $0x10] sm:$0xf] }
   0xa   :  { %679 = vmatpush.bf16.msra.mxu0 %v1737_v9  ;;  %1743 = vmatpush.bf16.msra.mxu2 %v1737_v9  ;;  %v1671_v40 = vld [vmem:[%s2746_s0 + $0x14] sm:$0xf0]  ;;  %v1482_v41 = vld [vmem:[%s2746_s0 + $0x110] sm:$0xf]  ;;  %v1503_v43 = vor.u32 %v1706_v36, %v1500_v37  ;;  %v1674_v46 = vld [vmem:[%s2746_s0 + $0x34] sm:$0xf] }
   0xb   :  { %v1703_v42 = vld [vmem:[%s2746_s0 + $0x114] sm:$0xf0]  ;;  %v1355_v44 = vor.u32 %v1671_v40, %v1354_v39  ;;  %v1372_v47 = vld [vmem:[%s2746_s0 + $0x38] sm:$0xf0]  ;;  %v1708_v48 = vld [vmem:[%s2746_s0 + $0x144] sm:$0xf] }
   0xc   :  { %853 = vmatpush.bf16.msra.mxu1 %v1740_v10  ;;  %1750 = vmatpush.bf16.msra.mxu3 %v1740_v10  ;;  %v1483_v45 = vor.u32 %v1703_v42, %v1482_v41  ;;  %v1508_v49 = vld [vmem:[%s2746_s0 + $0x148] sm:$0xf0]  ;;  %v1375_v50 = vor.u32 %v1674_v46, %v1372_v47  ;;  %v1362_v51 = vld [vmem:[%s2746_s0 + $0x20] sm:$0xf]  ;;  %v1673_v52 = vld [vmem:[%s2746_s0 + $0x24] sm:$0xf0] }
   0xd   :  { %v1490_v53 = vld [vmem:[%s2746_s0 + $0x120] sm:$0xf]  ;;  %v1705_v54 = vld [vmem:[%s2746_s0 + $0x124] sm:$0xf0]  ;;  %v1511_v55 = vor.u32 %v1708_v48, %v1508_v49  ;;  %v1363_v56 = vor.u32 %v1673_v52, %v1362_v51  ;;  %v1676_v58 = vld [vmem:[%s2746_s0 + $0x44] sm:$0xf] }
   0xe   :  { %680 = vmatpush.bf16.msra.mxu0 %v1736_v16  ;;  %1744 = vmatpush.bf16.msra.mxu2 %v1736_v16  ;;  %v1491_v57 = vor.u32 %v1705_v54, %v1490_v53  ;;  %v1380_v59 = vld [vmem:[%s2746_s0 + $0x48] sm:$0xf0]  ;;  %v1710_v60 = vld [vmem:[%s2746_s0 + $0x154] sm:$0xf]  ;;  %v1516_v61 = vld [vmem:[%s2746_s0 + $0x158] sm:$0xf0] }
   0xf   :  { %1636 = vmatmul.msk.bf16.vlgmr.msra.gmra.mxu1 %vm573_vm2, %v1351_v15  ;;  %1653 = vmatmul.msk.bf16.vlgmr.msra.gmra.mxu3 %vm573_vm2, %v1487_v17  ;;  %v1383_v62 = vor.u32 %v1676_v58, %v1380_v59  ;;  %v1370_v63 = vld [vmem:[%s2746_s0 + $0x30] sm:$0xf]  ;;  %v1675_v0 = vld [vmem:[%s2746_s0 + $0x34] sm:$0xf0]  ;;  %v1519_v3 = vor.u32 %v1710_v60, %v1516_v61  ;;  %v1678_v6 = vld [vmem:[%s2746_s0 + $0x54] sm:$0xf] }
  0x10   :  { %v1498_v1 = vld [vmem:[%s2746_s0 + $0x130] sm:$0xf]  ;;  %v1707_v2 = vld [vmem:[%s2746_s0 + $0x134] sm:$0xf0]  ;;  %v1371_v4 = vor.u32 %v1675_v0, %v1370_v63  ;;  %v1388_v7 = vld [vmem:[%s2746_s0 + $0x58] sm:$0xf0] }
  0x11   :  { %v1499_v5 = vor.u32 %v1707_v2, %v1498_v1  ;;  %v1712_v8 = vld [vmem:[%s2746_s0 + $0x164] sm:$0xf]  ;;  %v1524_v9 = vld [vmem:[%s2746_s0 + $0x168] sm:$0xf0]  ;;  %v1391_v10 = vor.u32 %v1678_v6, %v1388_v7  ;;  %v1378_v11 = vld [vmem:[%s2746_s0 + $0x40] sm:$0xf] }
  0x12   :  { %681 = vmatpush.bf16.msra.mxu0 %v1735_v18  ;;  %1745 = vmatpush.bf16.msra.mxu2 %v1735_v18  ;;  %v1677_v12 = vld [vmem:[%s2746_s0 + $0x44] sm:$0xf0]  ;;  %v1506_v13 = vld [vmem:[%s2746_s0 + $0x140] sm:$0xf]  ;;  %v1527_v15 = vor.u32 %v1712_v8, %v1524_v9  ;;  %v1680_v18 = vld [vmem:[%s2746_s0 + $0x64] sm:$0xf] }
  0x13   :  { %v1709_v14 = vld [vmem:[%s2746_s0 + $0x144] sm:$0xf0]  ;;  %v1379_v16 = vor.u32 %v1677_v12, %v1378_v11  ;;  %v1532_v21 = vld [vmem:[%s2746_s0 + $0x178] sm:$0xf0]  ;;  %v1386_v23 = vld [vmem:[%s2746_s0 + $0x50] sm:$0xf] }
  0x14   :  { %v1507_v17 = vor.u32 %v1709_v14, %v1506_v13  ;;  %v1679_v24 = vld [vmem:[%s2746_s0 + $0x54] sm:$0xf0]  ;;  %v1682_v30 = vld [vmem:[%s2746_s0 + $0x74] sm:$0xf]  ;;  %v1394_v35 = vld [vmem:[%s2746_s0 + $0x60] sm:$0xf] }
  0x15   :  { %v1387_v28 = vor.u32 %v1679_v24, %v1386_v23  ;;  %v1681_v36 = vld [vmem:[%s2746_s0 + $0x64] sm:$0xf0]  ;;  %v1754_v37 = vmov 0.0   ;;  %v1402_v46 = vld [vmem:[%s2746_s0 + $0x70] sm:$0xf] }
  0x16   :  { %682 = vmatpush.bf16.msra.mxu0 %v1734_v19  ;;  %1746 = vmatpush.bf16.msra.mxu2 %v1734_v19  ;;  %v1396_v19 = vld [vmem:[%s2746_s0 + $0x68] sm:$0xf0]  ;;  %17 = vst.msk [vmem:[#allocation2] sm:$0xff] %vm16_vm3, %v1754_v37  ;;  %v1713_v39 = vld [vmem:[%s2746_s0 + $0x164] sm:$0xf0]  ;;  %v1395_v41 = vor.u32 %v1681_v36, %v1394_v35 }
  0x17   :  { %v1399_v22 = vor.u32 %v1680_v18, %v1396_v19  ;;  %18 = vst.msk [vmem:[#allocation2 + $0x8] sm:$0xff] %vm16_vm3, %v1754_v37  ;;  %v1683_v47 = vld [vmem:[%s2746_s0 + $0x74] sm:$0xf0]  ;;  %v1530_v49 = vld [vmem:[%s2746_s0 + $0x170] sm:$0xf] }
  0x18   :  { %19 = vst.msk [vmem:[#allocation2 + $0x10] sm:$0xff] %vm16_vm3, %v1754_v37  ;;  %v1403_v51 = vor.u32 %v1683_v47, %v1402_v46  ;;  %v1686_v54 = vld [vmem:[%s2746_s0 + $0x94] sm:$0xf]  ;;  %v1410_v60 = vld [vmem:[%s2746_s0 + $0x80] sm:$0xf] }
  0x19   :  { %20 = vst.msk [vmem:[#allocation2 + $0x18] sm:$0xff] %vm16_vm3, %v1754_v37  ;;  %v1685_v61 = vld [vmem:[%s2746_s0 + $0x84] sm:$0xf0]  ;;  %v1538_v63 = vld [vmem:[%s2746_s0 + $0x180] sm:$0xf] }
  0x1a   :  { %683 = vmatpush.bf16.msra.mxu0 %v1733_v20  ;;  %1747 = vmatpush.bf16.msra.mxu2 %v1733_v20  ;;  %v1714_v20 = vld [vmem:[%s2746_s0 + $0x174] sm:$0xf]  ;;  %21 = vst.msk [vmem:[#allocation2 + $0x20] sm:$0xff] %vm16_vm3, %v1754_v37  ;;  %v1717_v0 = vld [vmem:[%s2746_s0 + $0x184] sm:$0xf0]  ;;  %v1411_v1 = vor.u32 %v1685_v61, %v1410_v60 }
  0x1b   :  { %v1535_v27 = vor.u32 %v1714_v20, %v1532_v21  ;;  %22 = vst.msk [vmem:[#allocation2 + $0x28] sm:$0xff] %vm16_vm3, %v1754_v37  ;;  %v1688_v12 = vld [vmem:[%s2746_s0 + $0xa4] sm:$0xf]  ;;  %v1428_v13 = vld [vmem:[%s2746_s0 + $0xa8] sm:$0xf0] }
  0x1c   :  { %23 = vst.msk [vmem:[#allocation2 + $0x30] sm:$0xff] %vm16_vm3, %v1754_v37  ;;  %v1720_v14 = vld [vmem:[%s2746_s0 + $0x1a4] sm:$0xf]  ;;  %v1431_v18 = vor.u32 %v1688_v12, %v1428_v13  ;;  %v1418_v19 = vld [vmem:[%s2746_s0 + $0x90] sm:$0xf] }
  0x1d   :  { %24 = vst.msk [vmem:[#allocation2 + $0x38] sm:$0xff] %vm16_vm3, %v1754_v37  ;;  %v1687_v20 = vld [vmem:[%s2746_s0 + $0x94] sm:$0xf0]  ;;  %v1546_v23 = vld [vmem:[%s2746_s0 + $0x190] sm:$0xf] }
  0x1e   :  { %684 = vmatpush.bf16.msra.mxu0 %v1732_v26  ;;  %1748 = vmatpush.bf16.msra.mxu2 %v1732_v26  ;;  %v1711_v26 = vld [vmem:[%s2746_s0 + $0x154] sm:$0xf0]  ;;  %25 = vst.msk [vmem:[#allocation2 + $0x40] sm:$0xff] %vm16_vm3, %v1754_v37  ;;  %v1722_v36 = vld [vmem:[%s2746_s0 + $0x1b4] sm:$0xf] }
  0x1f   :  { %1637 = vmatmul.msk.bf16.gmra.mxu1 %vm573_vm2, %v1359_v25  ;;  %1654 = vmatmul.msk.bf16.gmra.mxu3 %vm573_vm2, %v1495_v31  ;;  %v1514_v25 = vld [vmem:[%s2746_s0 + $0x150] sm:$0xf]  ;;  %v1404_v31 = vld [vmem:[%s2746_s0 + $0x78] sm:$0xf0]  ;;  %26 = vst.msk [vmem:[#allocation2 + $0x48] sm:$0xff] %vm16_vm3, %v1754_v37 }
  0x20   :  { %v1515_v29 = vor.u32 %v1711_v26, %v1514_v25  ;;  %v1407_v34 = vor.u32 %v1682_v30, %v1404_v31  ;;  %27 = vst.msk [vmem:[#allocation2 + $0x50] sm:$0xff] %vm16_vm3, %v1754_v37  ;;  %v1719_v24 = vld [vmem:[%s2746_s0 + $0x194] sm:$0xf0]  ;;  %v1419_v26 = vor.u32 %v1687_v20, %v1418_v19  ;;  %v1436_v46 = vld [vmem:[%s2746_s0 + $0xb8] sm:$0xf0] }
  0x21   :  { %685 = vmatmul.bf16.vlgmr.msra.gmra.mxu0 %v1347_v32  ;;  %765 = vmatmul.bf16.vlgmr.msra.gmra.mxu2 %v1475_v33  ;;  %v1716_v32 = vld [vmem:[%s2746_s0 + $0x184] sm:$0xf]  ;;  %v1540_v33 = vld [vmem:[%s2746_s0 + $0x188] sm:$0xf0]  ;;  %28 = vst.msk [vmem:[#allocation2 + $0x58] sm:$0xff] %vm16_vm3, %v1754_v37 }
  0x22   :  { %v1543_v40 = vor.u32 %v1716_v32, %v1540_v33  ;;  %29 = vst.msk [vmem:[#allocation2 + $0x60] sm:$0xff] %vm16_vm3, %v1754_v37  ;;  %v82_v32 = vld [vmem:[#allocation2 + $0x8] sm:$0xff] }
  0x23   :  { %30 = vst.msk [vmem:[#allocation2 + $0x68] sm:$0xff] %vm16_vm3, %v1754_v37  ;;  %v86_v19 = vld [vmem:[#allocation2 + $0x28] sm:$0xff] }
  0x24   :  { %31 = vst.msk [vmem:[#allocation2 + $0x70] sm:$0xff] %vm16_vm3, %v1754_v37 }
  0x25   :  { %32 = vst.msk [vmem:[#allocation2 + $0x78] sm:$0xff] %vm16_vm3, %v1754_v37 }
  0x26   :  { %33 = vst.msk [vmem:[#allocation2 + $0x80] sm:$0xff] %vm16_vm3, %v1754_v37 }
  0x27   :  { %34 = vst.msk [vmem:[#allocation2 + $0x88] sm:$0xff] %vm16_vm3, %v1754_v37 }
  0x28   :  { %35 = vst.msk [vmem:[#allocation2 + $0x90] sm:$0xff] %vm16_vm3, %v1754_v37 }
  0x29   :  { %36 = vst.msk [vmem:[#allocation2 + $0x98] sm:$0xff] %vm16_vm3, %v1754_v37 }
  0x2a   :  { %37 = vst.msk [vmem:[#allocation2 + $0xa0] sm:$0xff] %vm16_vm3, %v1754_v37 }
  0x2b   :  { %38 = vst.msk [vmem:[#allocation2 + $0xa8] sm:$0xff] %vm16_vm3, %v1754_v37 }
  0x2c   :  { %39 = vst.msk [vmem:[#allocation2 + $0xb0] sm:$0xff] %vm16_vm3, %v1754_v37 }
  0x2d   :  { %40 = vst.msk [vmem:[#allocation2 + $0xb8] sm:$0xff] %vm16_vm3, %v1754_v37 }
  0x2e   :  { %41 = vst.msk [vmem:[#allocation2 + $0xc0] sm:$0xff] %vm16_vm3, %v1754_v37 }
  0x2f   :  { %1638 = vmatmul.msk.bf16.gmra.mxu1 %vm573_vm2, %v1367_v38  ;;  %1655 = vmatmul.msk.bf16.gmra.mxu3 %vm573_vm2, %v1503_v43  ;;  %v1522_v38 = vld [vmem:[%s2746_s0 + $0x160] sm:$0xf]  ;;  %v1684_v43 = vld [vmem:[%s2746_s0 + $0x84] sm:$0xf]  ;;  %42 = vst.msk [vmem:[#allocation2 + $0xc8] sm:$0xff] %vm16_vm3, %v1754_v37 }
  0x30   :  { %v1523_v42 = vor.u32 %v1713_v39, %v1522_v38  ;;  %43 = vst.msk [vmem:[#allocation2 + $0xd0] sm:$0xff] %vm16_vm3, %v1754_v37  ;;  %v1564_v38 = vld [vmem:[%s2746_s0 + $0x1b8] sm:$0xf0]  ;;  %v83_v39 = vld [vmem:[#allocation2 + $0x10] sm:$0xff] }
  0x31   :  { %690 = vmatmul.bf16.gmra.mxu0 %v1355_v44  ;;  %770 = vmatmul.bf16.gmra.mxu2 %v1483_v45  ;;  %v1412_v44 = vld [vmem:[%s2746_s0 + $0x88] sm:$0xf0]  ;;  %44 = vst.msk [vmem:[#allocation2 + $0xd8] sm:$0xff] %vm16_vm3, %v1754_v37 }
  0x32   :  { %v1415_v45 = vor.u32 %v1684_v43, %v1412_v44  ;;  %45 = vst.msk [vmem:[#allocation2 + $0xe0] sm:$0xff] %vm16_vm3, %v1754_v37 }
  0x33   :  { %46 = vst.msk [vmem:[#allocation2 + $0xe8] sm:$0xff] %vm16_vm3, %v1754_v37 }
  0x34   :  { %47 = vst.msk [vmem:[#allocation2 + $0xf0] sm:$0xff] %vm16_vm3, %v1754_v37 }
  0x35   :  { %48 = vst.msk [vmem:[#allocation2 + $0xf8] sm:$0xff] %vm16_vm3, %v1754_v37 }
  0x36   :  { %49 = vst.msk [vmem:[#allocation2 + $0x100] sm:$0xff] %vm16_vm3, %v1754_v37 }
  0x37   :  { %50 = vst.msk [vmem:[#allocation2 + $0x108] sm:$0xff] %vm16_vm3, %v1754_v37 }
  0x38   :  { %51 = vst.msk [vmem:[#allocation2 + $0x110] sm:$0xff] %vm16_vm3, %v1754_v37 }
  0x39   :  { %52 = vst.msk [vmem:[#allocation2 + $0x118] sm:$0xff] %vm16_vm3, %v1754_v37 }
  0x3a   :  { %53 = vst.msk [vmem:[#allocation2 + $0x120] sm:$0xff] %vm16_vm3, %v1754_v37 }
  0x3b   :  { %54 = vst.msk [vmem:[#allocation2 + $0x128] sm:$0xff] %vm16_vm3, %v1754_v37 }
  0x3c   :  { %55 = vst.msk [vmem:[#allocation2 + $0x130] sm:$0xff] %vm16_vm3, %v1754_v37 }
  0x3d   :  { %56 = vst.msk [vmem:[#allocation2 + $0x138] sm:$0xff] %vm16_vm3, %v1754_v37 }
  0x3e   :  { %57 = vst.msk [vmem:[#allocation2 + $0x140] sm:$0xff] %vm16_vm3, %v1754_v37 }
  0x3f   :  { %1639 = vmatmul.msk.bf16.gmra.mxu1 %vm573_vm2, %v1375_v50  ;;  %1656 = vmatmul.msk.bf16.gmra.mxu3 %vm573_vm2, %v1511_v55  ;;  %v1715_v50 = vld [vmem:[%s2746_s0 + $0x174] sm:$0xf0]  ;;  %v1420_v55 = vld [vmem:[%s2746_s0 + $0x98] sm:$0xf0]  ;;  %58 = vst.msk [vmem:[#allocation2 + $0x148] sm:$0xff] %vm16_vm3, %v1754_v37  ;;  %v115_v43 = vld [vmem:[#allocation2 + $0x110] sm:$0xff] }
  0x40   :  { %v1531_v52 = vor.u32 %v1715_v50, %v1530_v49  ;;  %v1423_v59 = vor.u32 %v1686_v54, %v1420_v55  ;;  %59 = vst.msk [vmem:[#allocation2 + $0x150] sm:$0xff] %vm16_vm3, %v1754_v37 }
  0x41   :  { %695 = vmatmul.bf16.gmra.mxu0 %v1363_v56  ;;  %775 = vmatmul.bf16.gmra.mxu2 %v1491_v57  ;;  %v1718_v56 = vld [vmem:[%s2746_s0 + $0x194] sm:$0xf]  ;;  %v1548_v57 = vld [vmem:[%s2746_s0 + $0x198] sm:$0xf0]  ;;  %60 = vst.msk [vmem:[#allocation2 + $0x158] sm:$0xff] %vm16_vm3, %v1754_v37 }
  0x42   :  { %v1551_v58 = vor.u32 %v1718_v56, %v1548_v57  ;;  %61 = vst.msk [vmem:[#allocation2 + $0x160] sm:$0xff] %vm16_vm3, %v1754_v37  ;;  %v1554_v56 = vld [vmem:[%s2746_s0 + $0x1a0] sm:$0xf]  ;;  %v1721_v57 = vld [vmem:[%s2746_s0 + $0x1a4] sm:$0xf0] }
  0x43   :  { %62 = vst.msk [vmem:[#allocation2 + $0x168] sm:$0xff] %vm16_vm3, %v1754_v37 }
  0x44   :  { %63 = vst.msk [vmem:[#allocation2 + $0x170] sm:$0xff] %vm16_vm3, %v1754_v37 }
  0x45   :  { %64 = vst.msk [vmem:[#allocation2 + $0x178] sm:$0xff] %vm16_vm3, %v1754_v37 }
  0x46   :  { %65 = vst.msk [vmem:[#allocation2 + $0x180] sm:$0xff] %vm16_vm3, %v1754_v37 }
  0x47   :  { %66 = vst.msk [vmem:[#allocation2 + $0x188] sm:$0xff] %vm16_vm3, %v1754_v37 }
  0x48   :  { %67 = vst.msk [vmem:[#allocation2 + $0x190] sm:$0xff] %vm16_vm3, %v1754_v37 }
  0x49   :  { %68 = vst.msk [vmem:[#allocation2 + $0x198] sm:$0xff] %vm16_vm3, %v1754_v37 }
  0x4a   :  { %69 = vst.msk [vmem:[#allocation2 + $0x1a0] sm:$0xff] %vm16_vm3, %v1754_v37 }
  0x4b   :  { %70 = vst.msk [vmem:[#allocation2 + $0x1a8] sm:$0xff] %vm16_vm3, %v1754_v37 }
  0x4c   :  { %71 = vst.msk [vmem:[#allocation2 + $0x1b0] sm:$0xff] %vm16_vm3, %v1754_v37 }
  0x4d   :  { %72 = vst.msk [vmem:[#allocation2 + $0x1b8] sm:$0xff] %vm16_vm3, %v1754_v37 }
  0x4e   :  { %73 = vst.msk [vmem:[#allocation2 + $0x1c0] sm:$0xff] %vm16_vm3, %v1754_v37 }
  0x4f   :  { %1640 = vmatmul.msk.bf16.gmra.mxu1 %vm573_vm2, %v1383_v62  ;;  %1657 = vmatmul.msk.bf16.gmra.mxu3 %vm573_vm2, %v1519_v3  ;;  %v81_v3 = vld [vmem:[#allocation2] sm:$0xff]  ;;  %74 = vst.msk [vmem:[#allocation2 + $0x1c8] sm:$0xff] %vm16_vm3, %v1754_v37 }
  0x50   :  { %75 = vst.msk [vmem:[#allocation2 + $0x1d0] sm:$0xff] %vm16_vm3, %v1754_v37 }
  0x51   :  { %700 = vmatmul.bf16.gmra.mxu0 %v1371_v4  ;;  %780 = vmatmul.bf16.gmra.mxu2 %v1499_v5  ;;  %v1539_v5 = vor.u32 %v1717_v0, %v1538_v63  ;;  %76 = vst.msk [vmem:[#allocation2 + $0x1d8] sm:$0xff] %vm16_vm3, %v1754_v37  ;;  %v1555_v0 = vor.u32 %v1721_v57, %v1554_v56 }
  0x52   :  { %77 = vst.msk [vmem:[#allocation2 + $0x1e0] sm:$0xff] %vm16_vm3, %v1754_v37 }
  0x53   :  { %78 = vst.msk [vmem:[#allocation2 + $0x1e8] sm:$0xff] %vm16_vm3, %v1754_v37 }
  0x54   :  { %79 = vst.msk [vmem:[#allocation2 + $0x1f0] sm:$0xff] %vm16_vm3, %v1754_v37 }
  0x55   :  { %80 = vst.msk [vmem:[#allocation2 + $0x1f8] sm:$0xff] %vm16_vm3, %v1754_v37 }
  0x5f   :  { %1641 = vmatmul.msk.bf16.gmra.mxu1 %vm573_vm2, %v1391_v10  ;;  %1658 = vmatmul.msk.bf16.gmra.mxu3 %vm573_vm2, %v1527_v15  ;;  %v1556_v15 = vld [vmem:[%s2746_s0 + $0x1a8] sm:$0xf0] }
  0x61   :  { %705 = vmatmul.bf16.gmra.mxu0 %v1379_v16  ;;  %785 = vmatmul.bf16.gmra.mxu2 %v1507_v17  ;;  %v1559_v16 = vor.u32 %v1720_v14, %v1556_v15  ;;  %v1724_v14 = vld [vmem:[%s2746_s0 + $0x1c4] sm:$0xf]  ;;  %v1572_v15 = vld [vmem:[%s2746_s0 + $0x1c8] sm:$0xf0] }
  0x6f   :  { %1642 = vmatmul.msk.bf16.gmra.mxu1 %vm573_vm2, %v1399_v22  ;;  %1659 = vmatmul.msk.bf16.gmra.mxu3 %vm573_vm2, %v1535_v27 }
  0x71   :  { %710 = vmatmul.bf16.gmra.mxu0 %v1387_v28  ;;  %790 = vmatmul.bf16.gmra.mxu2 %v1515_v29  ;;  %v1547_v29 = vor.u32 %v1719_v24, %v1546_v23  ;;  %v1692_v24 = vld [vmem:[%s2746_s0 + $0xc4] sm:$0xf] }
  0x7f   :  { %1643 = vmatmul.msk.bf16.gmra.mxu1 %vm573_vm2, %v1407_v34  ;;  %1660 = vmatmul.msk.bf16.gmra.mxu3 %vm573_vm2, %v1543_v40 }
  0x81   :  { %715 = vmatmul.bf16.gmra.mxu0 %v1395_v41  ;;  %795 = vmatmul.bf16.gmra.mxu2 %v1523_v42  ;;  %v1567_v42 = vor.u32 %v1722_v36, %v1564_v38 }
  0x8c   :  { %v855_v48 = vpop.f32.mrf.mxu1 }
  0x8f   :  { %1644 = vmatmul.msk.bf16.gmra.mxu1 %vm573_vm2, %v1415_v45  ;;  %1661 = vmatmul.msk.bf16.gmra.mxu3 %vm573_vm2, %v1551_v58  ;;  %v1690_v45 = vld [vmem:[%s2746_s0 + $0xb4] sm:$0xf]  ;;  %v116_v58 = vld [vmem:[#allocation2 + $0x118] sm:$0xff] }
  0x91   :  { %720 = vmatmul.bf16.gmra.mxu0 %v1403_v51  ;;  %800 = vmatmul.bf16.gmra.mxu2 %v1531_v52  ;;  %v1439_v51 = vor.u32 %v1690_v45, %v1436_v46  ;;  %v1426_v52 = vld [vmem:[%s2746_s0 + $0xa0] sm:$0xf]  ;;  %v87_v46 = vld [vmem:[#allocation2 + $0x30] sm:$0xff] }
  0x92   :  { %v2116_v2 = vpop.f32.mrf.mxu3 }
  0x94   :  { %v2065_v53 = vpop.f32.mrf.mxu1 }
  0x9a   :  { %v2136_v10 = vpop.f32.mrf.mxu3 }
  0x9c   :  { %v2102_v62 = vpop.f32.mrf.mxu1 }
  0x9e   :  { %v686_v4 = vpop.f32.mrf.mxu0 }
  0x9f   :  { %1645 = vmatmul.msk.bf16.gmra.mxu1 %vm573_vm2, %v1423_v59  ;;  %v856_v6 = vadd.f32 %v855_v48, %v686_v4  ;;  %1662 = vmatmul.msk.bf16.gmra.mxu3 %vm573_vm2, %v1559_v16  ;;  %v84_v48 = vld [vmem:[#allocation2 + $0x18] sm:$0xff] }
  0xa1   :  { %v1015_v7 = vadd.f32 %v856_v6, %v81_v3  ;;  %725 = vmatmul.bf16.gmra.mxu0 %v1411_v1  ;;  %805 = vmatmul.bf16.gmra.mxu2 %v1539_v5 }
  0xa2   :  { %v2185_v27 = vpop.f32.mrf.mxu3 }
  0xa3   :  { %1080 = vst.msk [vmem:[#allocation2] sm:$0xff] %vm16_vm3, %v1015_v7 }
  0xa4   :  { %v862_v8 = vpop.f32.mrf.mxu1  ;;  %v2134_v9 = vpop.f32.mrf.mxu2 }
  0xa6   :  { %v688_v11 = vpop.f32.mrf.mxu0 }
  0xa7   :  { %v858_v31 = vadd.f32 %v2065_v53, %v688_v11  ;;  %v1689_v53 = vld [vmem:[%s2746_s0 + $0xa4] sm:$0xf0] }
  0xa8   :  { %v1427_v60 = vor.u32 %v1689_v53, %v1426_v52 }
  0xa9   :  { %v1016_v47 = vadd.f32 %v858_v31, %v82_v32 }
  0xaa   :  { %v1147_v17 = vld [vmem:[#allocation2] sm:$0xff]  ;;  %v2208_v35 = vpop.f32.mrf.mxu3 }
  0xab   :  { %v1211_v21 = vpack.c.bf16 %v1147_v17, %v1147_v17  ;;  %1081 = vst.msk [vmem:[#allocation2 + $0x8] sm:$0xff] %vm16_vm3, %v1016_v47 }
  0xac   :  { %v2169_v22 = vpop.f32.mrf.mxu1  ;;  %v2183_v25 = vpop.f32.mrf.mxu2 }
  0xad   :  { %1276 = vst.msk [vmem:[%s2747_s2] sm:$0xf] %vm1275_vm4, %v1211_v21  ;;  %v1575_v21 = vor.u32 %v1724_v14, %v1572_v15  ;;  %v1570_v15 = vld [vmem:[%s2746_s0 + $0x1c0] sm:$0xf] }
  0xae   :  { %v691_v28 = vpop.f32.mrf.mxu0 }
  0xaf   :  { %1646 = vmatmul.msk.bf16.gmra.mxu1 %vm573_vm2, %v1431_v18  ;;  %v861_v33 = vadd.f32 %v2102_v62, %v691_v28  ;;  %1663 = vmatmul.msk.bf16.gmra.mxu3 %vm573_vm2, %v1567_v42  ;;  %v85_v62 = vld [vmem:[#allocation2 + $0x20] sm:$0xff] }
  0xb1   :  { %730 = vmatmul.bf16.gmra.mxu0 %v1419_v26  ;;  %810 = vmatmul.bf16.gmra.mxu2 %v1547_v29  ;;  %v1017_v49 = vadd.f32 %v861_v33, %v83_v39  ;;  %v1444_v26 = vld [vmem:[%s2746_s0 + $0xc8] sm:$0xf0]  ;;  %v1434_v33 = vld [vmem:[%s2746_s0 + $0xb0] sm:$0xf] }
  0xb2   :  { %v2252_v61 = vpop.f32.mrf.mxu3  ;;  %v1148_v4 = vld [vmem:[#allocation2 + $0x8] sm:$0xff]  ;;  %v1447_v32 = vor.u32 %v1692_v24, %v1444_v26  ;;  %v1562_v39 = vld [vmem:[%s2746_s0 + $0x1b0] sm:$0xf] }
  0xb3   :  { %1082 = vst.msk [vmem:[#allocation2 + $0x10] sm:$0xff] %vm16_vm3, %v1017_v49  ;;  %v1212_v6 = vpack.c.bf16 %v1148_v4, %v1148_v4 }
  0xb4   :  { %v2200_v30 = vpop.f32.mrf.mxu1  ;;  %v771_v34 = vpop.f32.mrf.mxu2 }
  0xb5   :  { %v941_v40 = vadd.f32 %v2116_v2, %v771_v34  ;;  %1277 = vst.msk [vmem:[%s2747_s2 + $0x4] sm:$0xf] %vm1275_vm4, %v1212_v6  ;;  %v1691_v34 = vld [vmem:[%s2746_s0 + $0xb4] sm:$0xf0] }
  0xb6   :  { %v693_v41 = vpop.f32.mrf.mxu0 }
  0xb7   :  { %v863_v44 = vadd.f32 %v862_v8, %v693_v41  ;;  %v1049_v50 = vadd.f32 %v941_v40, %v115_v43  ;;  %v117_v8 = vld [vmem:[#allocation2 + $0x120] sm:$0xff]  ;;  %v1723_v40 = vld [vmem:[%s2746_s0 + $0x1b4] sm:$0xf0]  ;;  %v118_v41 = vld [vmem:[#allocation2 + $0x128] sm:$0xff]  ;;  %v1435_v43 = vor.u32 %v1691_v34, %v1434_v33 }
  0xb8   :  { %v121_v33 = vld [vmem:[#allocation2 + $0x140] sm:$0xff] }
  0xb9   :  { %v1018_v54 = vadd.f32 %v863_v44, %v84_v48  ;;  %1114 = vst.msk [vmem:[#allocation2 + $0x110] sm:$0xff] %vm16_vm3, %v1049_v50  ;;  %v1563_v48 = vor.u32 %v1723_v40, %v1562_v39  ;;  %v1588_v39 = vld [vmem:[%s2746_s0 + $0x1e8] sm:$0xf0] }
  0xba   :  { %v1149_v7 = vld [vmem:[#allocation2 + $0x10] sm:$0xff]  ;;  %v2263_v13 = vpop.f32.mrf.mxu3 }
  0xbb   :  { %1083 = vst.msk [vmem:[#allocation2 + $0x18] sm:$0xff] %vm16_vm3, %v1018_v54 }
  0xbc   :  { %v2242_v55 = vpop.f32.mrf.mxu1  ;;  %v773_v59 = vpop.f32.mrf.mxu2 }
  0xbd   :  { %v943_v37 = vadd.f32 %v2136_v10, %v773_v59  ;;  %v1213_v10 = vpack.c.bf16 %v1149_v7, %v1149_v7  ;;  %v1726_v59 = vld [vmem:[%s2746_s0 + $0x1d4] sm:$0xf] }
  0xbe   :  { %v696_v63 = vpop.f32.mrf.mxu0 }
  0xbf   :  { %1647 = vmatmul.msk.bf16.gmra.mxu1 %vm573_vm2, %v1439_v51  ;;  %v866_v1 = vadd.f32 %v2169_v22, %v696_v63  ;;  %v1050_v2 = vadd.f32 %v943_v37, %v116_v58  ;;  %1278 = vst.msk [vmem:[%s2747_s2 + $0x8] sm:$0xf] %vm1275_vm4, %v1213_v10  ;;  %1664 = vmatmul.msk.bf16.gmra.mxu3 %vm573_vm2, %v1575_v21 }
  0xc0   :  { %v1181_v11 = vld [vmem:[#allocation2 + $0x110] sm:$0xff] }
  0xc1   :  { %v1019_v3 = vadd.f32 %v866_v1, %v85_v62  ;;  %735 = vmatmul.bf16.gmra.mxu0 %v1427_v60  ;;  %1115 = vst.msk [vmem:[#allocation2 + $0x118] sm:$0xff] %vm16_vm3, %v1050_v2  ;;  %815 = vmatmul.bf16.gmra.mxu2 %v1555_v0  ;;  %v1245_v16 = vpack.c.bf16 %v1181_v11, %v1181_v11  ;;  %v1580_v60 = vld [vmem:[%s2746_s0 + $0x1d8] sm:$0xf0]  ;;  %v1694_v2 = vld [vmem:[%s2746_s0 + $0xd4] sm:$0xf] }
  0xc2   :  { %v1150_v17 = vld [vmem:[#allocation2 + $0x18] sm:$0xff]  ;;  %v2320_v44 = vpop.f32.mrf.mxu3  ;;  %v1583_v0 = vor.u32 %v1726_v59, %v1580_v60  ;;  %v1693_v11 = vld [vmem:[%s2746_s0 + $0xc4] sm:$0xf0] }
  0xc3   :  { %1084 = vst.msk [vmem:[#allocation2 + $0x20] sm:$0xff] %vm16_vm3, %v1019_v3  ;;  %v1214_v22 = vpack.c.bf16 %v1150_v17, %v1150_v17  ;;  %v88_v62 = vld [vmem:[#allocation2 + $0x38] sm:$0xff]  ;;  %v122_v59 = vld [vmem:[#allocation2 + $0x148] sm:$0xff] }
  0xc4   :  { %v2261_v5 = vpop.f32.mrf.mxu1  ;;  %v776_v12 = vpop.f32.mrf.mxu2  ;;  %1310 = vst.msk [vmem:[%s2747_s2 + $0x88] sm:$0xf] %vm1275_vm4, %v1245_v16  ;;  %v1452_v3 = vld [vmem:[%s2746_s0 + $0xd8] sm:$0xf0]  ;;  %v1725_v16 = vld [vmem:[%s2746_s0 + $0x1c4] sm:$0xf0] }
  0xc5   :  { %v946_v18 = vadd.f32 %v2185_v27, %v776_v12  ;;  %1279 = vst.msk [vmem:[%s2747_s2 + $0xc] sm:$0xf] %vm1275_vm4, %v1214_v22  ;;  %v120_v17 = vld [vmem:[#allocation2 + $0x138] sm:$0xff]  ;;  %v89_v22 = vld [vmem:[#allocation2 + $0x40] sm:$0xff]  ;;  %v1571_v24 = vor.u32 %v1725_v16, %v1570_v15 }
  0xc6   :  { %v698_v20 = vpop.f32.mrf.mxu0  ;;  %v1596_v15 = vld [vmem:[%s2746_s0 + $0x1f8] sm:$0xf0] }
  0xc7   :  { %v868_v23 = vadd.f32 %v2200_v30, %v698_v20  ;;  %v1051_v27 = vadd.f32 %v946_v18, %v117_v8 }
  0xc8   :  { %v1182_v28 = vld [vmem:[#allocation2 + $0x118] sm:$0xff] }
  0xc9   :  { %v1020_v29 = vadd.f32 %v868_v23, %v86_v19  ;;  %v1246_v30 = vpack.c.bf16 %v1182_v28, %v1182_v28  ;;  %1116 = vst.msk [vmem:[#allocation2 + $0x120] sm:$0xff] %vm16_vm3, %v1051_v27 }
  0xca   :  { %v1151_v31 = vld [vmem:[#allocation2 + $0x20] sm:$0xff]  ;;  %v2337_v58 = vpop.f32.mrf.mxu3 }
  0xcb   :  { %v1215_v36 = vpack.c.bf16 %v1151_v31, %v1151_v31  ;;  %1085 = vst.msk [vmem:[#allocation2 + $0x28] sm:$0xff] %vm16_vm3, %v1020_v29 }
  0xcc   :  { %v2304_v38 = vpop.f32.mrf.mxu1  ;;  %1311 = vst.msk [vmem:[%s2747_s2 + $0x8c] sm:$0xf] %vm1275_vm4, %v1246_v30  ;;  %v778_v42 = vpop.f32.mrf.mxu2 }
  0xcd   :  { %1280 = vst.msk [vmem:[%s2747_s2 + $0x10] sm:$0xf] %vm1275_vm4, %v1215_v36  ;;  %v948_v45 = vadd.f32 %v2208_v35, %v778_v42 }
  0xce   :  { %v701_v47 = vpop.f32.mrf.mxu0 }
  0xcf   :  { %1648 = vmatmul.msk.bf16.gmra.mxu1 %vm573_vm2, %v1447_v32  ;;  %v871_v49 = vadd.f32 %v2242_v55, %v701_v47  ;;  %v1052_v50 = vadd.f32 %v948_v45, %v118_v41  ;;  %v119_v55 = vld [vmem:[#allocation2 + $0x130] sm:$0xff]  ;;  %1665 = vmatmul.msk.bf16.gmra.mxu3 %vm573_vm2, %v1583_v0  ;;  %v90_v41 = vld [vmem:[#allocation2 + $0x48] sm:$0xff] }
  0xd0   :  { %v1183_v51 = vld [vmem:[#allocation2 + $0x120] sm:$0xff]  ;;  %v1460_v47 = vld [vmem:[%s2746_s0 + $0xe8] sm:$0xf0]  ;;  %v91_v0 = vld [vmem:[#allocation2 + $0x50] sm:$0xff] }
  0xd1   :  { %v1021_v52 = vadd.f32 %v871_v49, %v87_v46  ;;  %740 = vmatmul.bf16.gmra.mxu0 %v1435_v43  ;;  %v1247_v53 = vpack.c.bf16 %v1183_v51, %v1183_v51  ;;  %1117 = vst.msk [vmem:[#allocation2 + $0x128] sm:$0xff] %vm16_vm3, %v1052_v50  ;;  %820 = vmatmul.bf16.gmra.mxu2 %v1563_v48  ;;  %v1696_v46 = vld [vmem:[%s2746_s0 + $0xe4] sm:$0xf] }
  0xd2   :  { %v1152_v54 = vld [vmem:[#allocation2 + $0x28] sm:$0xff]  ;;  %v2378_v20 = vpop.f32.mrf.mxu3 }
  0xd3   :  { %v1216_v56 = vpack.c.bf16 %v1152_v54, %v1152_v54  ;;  %1086 = vst.msk [vmem:[#allocation2 + $0x30] sm:$0xff] %vm16_vm3, %v1021_v52  ;;  %v1695_v54 = vld [vmem:[%s2746_s0 + $0xd4] sm:$0xf0] }
  0xd4   :  { %v2327_v35 = vpop.f32.mrf.mxu1  ;;  %1312 = vst.msk [vmem:[%s2747_s2 + $0x90] sm:$0xf] %vm1275_vm4, %v1247_v53  ;;  %v781_v57 = vpop.f32.mrf.mxu2  ;;  %v1450_v53 = vld [vmem:[%s2746_s0 + $0xd0] sm:$0xf] }
  0xd5   :  { %1281 = vst.msk [vmem:[%s2747_s2 + $0x14] sm:$0xf] %vm1275_vm4, %v1216_v56  ;;  %v951_v37 = vadd.f32 %v2252_v61, %v781_v57  ;;  %v1455_v61 = vor.u32 %v1694_v2, %v1452_v3  ;;  %v1727_v57 = vld [vmem:[%s2746_s0 + $0x1d4] sm:$0xf0] }
  0xd6   :  { %v703_v63 = vpop.f32.mrf.mxu0 }
  0xd7   :  { %v873_v1 = vadd.f32 %v2261_v5, %v703_v63  ;;  %v1053_v4 = vadd.f32 %v951_v37, %v119_v55  ;;  %v1442_v5 = vld [vmem:[%s2746_s0 + $0xc0] sm:$0xf]  ;;  %v1578_v55 = vld [vmem:[%s2746_s0 + $0x1d0] sm:$0xf]  ;;  %v1451_v37 = vor.u32 %v1695_v54, %v1450_v53 }
  0xd8   :  { %v1184_v6 = vld [vmem:[#allocation2 + $0x128] sm:$0xff]  ;;  %v1443_v19 = vor.u32 %v1693_v11, %v1442_v5  ;;  %v1579_v2 = vor.u32 %v1727_v57, %v1578_v55  ;;  %v123_v5 = vld [vmem:[#allocation2 + $0x150] sm:$0xff]  ;;  %v125_v53 = vld [vmem:[#allocation2 + $0x160] sm:$0xff] }
  0xd9   :  { %v1022_v7 = vadd.f32 %v873_v1, %v88_v62  ;;  %v1248_v8 = vpack.c.bf16 %v1184_v6, %v1184_v6  ;;  %1118 = vst.msk [vmem:[#allocation2 + $0x130] sm:$0xff] %vm16_vm3, %v1053_v4  ;;  %v94_v55 = vld [vmem:[#allocation2 + $0x68] sm:$0xff] }
  0xda   :  { %v1153_v10 = vld [vmem:[#allocation2 + $0x30] sm:$0xff]  ;;  %v2395_v36 = vpop.f32.mrf.mxu3 }
  0xdb   :  { %v1217_v12 = vpack.c.bf16 %v1153_v10, %v1153_v10  ;;  %1087 = vst.msk [vmem:[#allocation2 + $0x38] sm:$0xff] %vm16_vm3, %v1022_v7 }
  0xdc   :  { %v2362_v14 = vpop.f32.mrf.mxu1  ;;  %1313 = vst.msk [vmem:[%s2747_s2 + $0x94] sm:$0xf] %vm1275_vm4, %v1248_v8  ;;  %v783_v18 = vpop.f32.mrf.mxu2 }
  0xdd   :  { %1282 = vst.msk [vmem:[%s2747_s2 + $0x18] sm:$0xf] %vm1275_vm4, %v1217_v12  ;;  %v953_v21 = vadd.f32 %v2263_v13, %v783_v18 }
  0xde   :  { %v706_v23 = vpop.f32.mrf.mxu0 }
  0xdf   :  { %1649 = vmatmul.msk.bf16.gmra.mxu1 %vm573_vm2, %v1455_v61  ;;  %v876_v26 = vadd.f32 %v2304_v38, %v706_v23  ;;  %v1054_v27 = vadd.f32 %v953_v21, %v120_v17  ;;  %v1728_v38 = vld [vmem:[%s2746_s0 + $0x1e4] sm:$0xf]  ;;  %v92_v17 = vld [vmem:[#allocation2 + $0x58] sm:$0xff] }
  0xe0   :  { %v1185_v28 = vld [vmem:[#allocation2 + $0x130] sm:$0xff]  ;;  %v1591_v43 = vor.u32 %v1728_v38, %v1588_v39  ;;  %v1468_v23 = vld [vmem:[%s2746_s0 + $0xf8] sm:$0xf0] }
  0xe1   :  { %v1023_v29 = vadd.f32 %v876_v26, %v89_v22  ;;  %745 = vmatmul.bf16.gmra.mxu0 %v1443_v19  ;;  %v1249_v30 = vpack.c.bf16 %v1185_v28, %v1185_v28  ;;  %1119 = vst.msk [vmem:[#allocation2 + $0x138] sm:$0xff] %vm16_vm3, %v1054_v27  ;;  %825 = vmatmul.bf16.gmra.mxu2 %v1571_v24  ;;  %v1698_v22 = vld [vmem:[%s2746_s0 + $0xf4] sm:$0xf]  ;;  %v124_v38 = vld [vmem:[#allocation2 + $0x158] sm:$0xff] }
  0xe2   :  { %v1154_v31 = vld [vmem:[#allocation2 + $0x38] sm:$0xff]  ;;  %1666 = vmatmul.msk.bf16.gmra.mxu3 %vm573_vm2, %v1591_v43  ;;  %v2436_v62 = vpop.f32.mrf.mxu3  ;;  %v93_v43 = vld [vmem:[#allocation2 + $0x60] sm:$0xff] }
  0xe3   :  { %v1218_v32 = vpack.c.bf16 %v1154_v31, %v1154_v31  ;;  %1088 = vst.msk [vmem:[#allocation2 + $0x40] sm:$0xff] %vm16_vm3, %v1023_v29  ;;  %v1697_v31 = vld [vmem:[%s2746_s0 + $0xe4] sm:$0xf0] }
  0xe4   :  { %v2385_v13 = vpop.f32.mrf.mxu1  ;;  %1314 = vst.msk [vmem:[%s2747_s2 + $0x98] sm:$0xf] %vm1275_vm4, %v1249_v30  ;;  %v786_v34 = vpop.f32.mrf.mxu2  ;;  %v1458_v30 = vld [vmem:[%s2746_s0 + $0xe0] sm:$0xf] }
  0xe5   :  { %1283 = vst.msk [vmem:[%s2747_s2 + $0x1c] sm:$0xf] %vm1275_vm4, %v1218_v32  ;;  %v956_v40 = vadd.f32 %v2320_v44, %v786_v34  ;;  %v1463_v44 = vor.u32 %v1696_v46, %v1460_v47  ;;  %v1729_v34 = vld [vmem:[%s2746_s0 + $0x1e4] sm:$0xf0] }
  0xe6   :  { %v708_v42 = vpop.f32.mrf.mxu0 }
  0xe7   :  { %v878_v45 = vadd.f32 %v2327_v35, %v708_v42  ;;  %v1055_v48 = vadd.f32 %v956_v40, %v121_v33  ;;  %v1586_v33 = vld [vmem:[%s2746_s0 + $0x1e0] sm:$0xf]  ;;  %v1459_v40 = vor.u32 %v1697_v31, %v1458_v30  ;;  %v96_v31 = vld [vmem:[#allocation2 + $0x78] sm:$0xff] }
  0xe8   :  { %v1186_v49 = vld [vmem:[#allocation2 + $0x138] sm:$0xff]  ;;  %v1587_v46 = vor.u32 %v1729_v34, %v1586_v33 }
  0xe9   :  { %v1024_v50 = vadd.f32 %v878_v45, %v90_v41  ;;  %v1250_v51 = vpack.c.bf16 %v1186_v49, %v1186_v49  ;;  %1120 = vst.msk [vmem:[#allocation2 + $0x140] sm:$0xff] %vm16_vm3, %v1055_v48 }
  0xea   :  { %v1155_v52 = vld [vmem:[#allocation2 + $0x40] sm:$0xff]  ;;  %v2451_v12 = vpop.f32.mrf.mxu3 }
  0xeb   :  { %v1219_v56 = vpack.c.bf16 %v1155_v52, %v1155_v52  ;;  %1089 = vst.msk [vmem:[#allocation2 + $0x48] sm:$0xff] %vm16_vm3, %v1024_v50 }
  0xec   :  { %v2420_v35 = vpop.f32.mrf.mxu1  ;;  %1315 = vst.msk [vmem:[%s2747_s2 + $0x9c] sm:$0xf] %vm1275_vm4, %v1250_v51  ;;  %v788_v60 = vpop.f32.mrf.mxu2 }
  0xed   :  { %1284 = vst.msk [vmem:[%s2747_s2 + $0x20] sm:$0xf] %vm1275_vm4, %v1219_v56  ;;  %v958_v63 = vadd.f32 %v2337_v58, %v788_v60  ;;  %v1700_v60 = vld [vmem:[%s2746_s0 + $0x104] sm:$0xf] }
  0xee   :  { %v711_v1 = vpop.f32.mrf.mxu0 }
  0xef   :  { %1650 = vmatmul.msk.bf16.gmra.mxu1 %vm573_vm2, %v1463_v44  ;;  %v881_v3 = vadd.f32 %v2362_v14, %v711_v1  ;;  %v1056_v4 = vadd.f32 %v958_v63, %v122_v59  ;;  %v1730_v14 = vld [vmem:[%s2746_s0 + $0x1f4] sm:$0xf] }
  0xf0   :  { %v1187_v6 = vld [vmem:[#allocation2 + $0x140] sm:$0xff]  ;;  %v1599_v19 = vor.u32 %v1730_v14, %v1596_v15 }
  0xf1   :  { %v1025_v7 = vadd.f32 %v881_v3, %v91_v0  ;;  %750 = vmatmul.bf16.gmra.mxu0 %v1451_v37  ;;  %v1251_v8 = vpack.c.bf16 %v1187_v6, %v1187_v6  ;;  %1121 = vst.msk [vmem:[#allocation2 + $0x148] sm:$0xff] %vm16_vm3, %v1056_v4  ;;  %830 = vmatmul.bf16.gmra.mxu2 %v1579_v2  ;;  %v1476_v37 = vld [vmem:[%s2746_s0 + $0x108] sm:$0xf0]  ;;  %v1699_v6 = vld [vmem:[%s2746_s0 + $0xf4] sm:$0xf0] }
  0xf2   :  { %v1156_v10 = vld [vmem:[#allocation2 + $0x48] sm:$0xff]  ;;  %1667 = vmatmul.msk.bf16.gmra.mxu3 %vm573_vm2, %v1599_v19  ;;  %v2490_v41 = vpop.f32.mrf.mxu3  ;;  %v1479_v4 = vor.u32 %v1700_v60, %v1476_v37 }
  0xf3   :  { %v1220_v61 = vpack.c.bf16 %v1156_v10, %v1156_v10  ;;  %1090 = vst.msk [vmem:[#allocation2 + $0x50] sm:$0xff] %vm16_vm3, %v1025_v7  ;;  %v1594_v10 = vld [vmem:[%s2746_s0 + $0x1f0] sm:$0xf]  ;;  %v98_v60 = vld [vmem:[#allocation2 + $0x88] sm:$0xff] }
  0xf4   :  { %v887_v58 = vpop.f32.mrf.mxu1  ;;  %1316 = vst.msk [vmem:[%s2747_s2 + $0xa0] sm:$0xf] %vm1275_vm4, %v1251_v8  ;;  %v791_v11 = vpop.f32.mrf.mxu2 }
  0xf5   :  { %1285 = vst.msk [vmem:[%s2747_s2 + $0x24] sm:$0xf] %vm1275_vm4, %v1220_v61  ;;  %v961_v16 = vadd.f32 %v2378_v20, %v791_v11  ;;  %v1471_v20 = vor.u32 %v1698_v22, %v1468_v23  ;;  %v1731_v61 = vld [vmem:[%s2746_s0 + $0x1f4] sm:$0xf0] }
  0xf6   :  { %v713_v18 = vpop.f32.mrf.mxu0 }
  0xf7   :  { %v883_v21 = vadd.f32 %v2385_v13, %v713_v18  ;;  %v1057_v24 = vadd.f32 %v961_v16, %v123_v5  ;;  %v95_v16 = vld [vmem:[#allocation2 + $0x70] sm:$0xff]  ;;  %v1595_v18 = vor.u32 %v1731_v61, %v1594_v10 }
  0xf8   :  { %v1188_v26 = vld [vmem:[#allocation2 + $0x148] sm:$0xff]  ;;  %v99_v61 = vld [vmem:[#allocation2 + $0x90] sm:$0xff] }
  0xf9   :  { %v1026_v27 = vadd.f32 %v883_v21, %v92_v17  ;;  %v1252_v28 = vpack.c.bf16 %v1188_v26, %v1188_v26  ;;  %1122 = vst.msk [vmem:[#allocation2 + $0x150] sm:$0xff] %vm16_vm3, %v1057_v24 }
  0xfa   :  { %v1157_v29 = vld [vmem:[#allocation2 + $0x50] sm:$0xff]  ;;  %v2505_v56 = vpop.f32.mrf.mxu3 }
  0xfb   :  { %v1221_v32 = vpack.c.bf16 %v1157_v29, %v1157_v29  ;;  %1091 = vst.msk [vmem:[#allocation2 + $0x58] sm:$0xff] %vm16_vm3, %v1026_v27 }
  0xfc   :  { %v890_v13 = vpop.f32.mrf.mxu1  ;;  %1317 = vst.msk [vmem:[%s2747_s2 + $0xa4] sm:$0xf] %vm1275_vm4, %v1252_v28  ;;  %v793_v39 = vpop.f32.mrf.mxu2 }
  0xfd   :  { %1286 = vst.msk [vmem:[%s2747_s2 + $0x28] sm:$0xf] %vm1275_vm4, %v1221_v32  ;;  %v963_v42 = vadd.f32 %v2395_v36, %v793_v39 }
  0xfe   :  { %v716_v45 = vpop.f32.mrf.mxu0 }
  0xff   :  { %1651 = vmatmul.msk.bf16.gmra.mxu1 %vm573_vm2, %v1471_v20  ;;  %v886_v47 = vadd.f32 %v2420_v35, %v716_v45  ;;  %v1058_v48 = vadd.f32 %v963_v42, %v124_v38 }
 0x100   :  { %v1189_v49 = vld [vmem:[#allocation2 + $0x150] sm:$0xff] }
 0x101   :  { %v1027_v50 = vadd.f32 %v886_v47, %v93_v43  ;;  %755 = vmatmul.bf16.gmra.mxu0 %v1459_v40  ;;  %v1253_v51 = vpack.c.bf16 %v1189_v49, %v1189_v49  ;;  %1123 = vst.msk [vmem:[#allocation2 + $0x158] sm:$0xff] %vm16_vm3, %v1058_v48  ;;  %835 = vmatmul.bf16.gmra.mxu2 %v1587_v46  ;;  %v97_v48 = vld [vmem:[#allocation2 + $0x80] sm:$0xff] }
 0x102   :  { %v1158_v52 = vld [vmem:[#allocation2 + $0x58] sm:$0xff]  ;;  %v975_v14 = vpop.f32.mrf.mxu3 }
 0x103   :  { %v1222_v44 = vpack.c.bf16 %v1158_v52, %v1158_v52  ;;  %1092 = vst.msk [vmem:[#allocation2 + $0x60] sm:$0xff] %vm16_vm3, %v1027_v50 }
 0x104   :  { %v892_v36 = vpop.f32.mrf.mxu1  ;;  %1318 = vst.msk [vmem:[%s2747_s2 + $0xa8] sm:$0xf] %vm1275_vm4, %v1253_v51  ;;  %v796_v54 = vpop.f32.mrf.mxu2 }
 0x105   :  { %1287 = vst.msk [vmem:[%s2747_s2 + $0x2c] sm:$0xf] %vm1275_vm4, %v1222_v44  ;;  %v966_v35 = vadd.f32 %v2436_v62, %v796_v54  ;;  %v1466_v62 = vld [vmem:[%s2746_s0 + $0xf0] sm:$0xf] }
 0x106   :  { %v718_v57 = vpop.f32.mrf.mxu0  ;;  %v1467_v11 = vor.u32 %v1699_v6, %v1466_v62 }
 0x107   :  { %v888_v59 = vadd.f32 %v887_v58, %v718_v57  ;;  %v1059_v63 = vadd.f32 %v966_v35, %v125_v53  ;;  %v126_v58 = vld [vmem:[#allocation2 + $0x168] sm:$0xff] }
 0x108   :  { %v1190_v0 = vld [vmem:[#allocation2 + $0x158] sm:$0xff] }
 0x109   :  { %v1028_v1 = vadd.f32 %v888_v59, %v94_v55  ;;  %v1254_v2 = vpack.c.bf16 %v1190_v0, %v1190_v0  ;;  %1124 = vst.msk [vmem:[#allocation2 + $0x160] sm:$0xff] %vm16_vm3, %v1059_v63 }
 0x10a   :  { %v1159_v3 = vld [vmem:[#allocation2 + $0x60] sm:$0xff]  ;;  %v977_v20 = vpop.f32.mrf.mxu3 }
 0x10b   :  { %v1223_v7 = vpack.c.bf16 %v1159_v3, %v1159_v3  ;;  %1093 = vst.msk [vmem:[#allocation2 + $0x68] sm:$0xff] %vm16_vm3, %v1028_v1 }
 0x10c   :  { %v895_v8 = vpop.f32.mrf.mxu1  ;;  %1319 = vst.msk [vmem:[%s2747_s2 + $0xac] sm:$0xf] %vm1275_vm4, %v1254_v2  ;;  %v798_v5 = vpop.f32.mrf.mxu2 }
 0x10d   :  { %1288 = vst.msk [vmem:[%s2747_s2 + $0x30] sm:$0xf] %vm1275_vm4, %v1223_v7  ;;  %v968_v15 = vadd.f32 %v2451_v12, %v798_v5  ;;  %v127_v12 = vld [vmem:[#allocation2 + $0x170] sm:$0xff]  ;;  %v130_v7 = vld [vmem:[#allocation2 + $0x188] sm:$0xff] }
 0x10e   :  { %v721_v17 = vpop.f32.mrf.mxu0 }
 0x10f   :  { %1652 = vmatmul.msk.bf16.gmra.mxu1 %vm573_vm2, %v1479_v4  ;;  %v891_v19 = vadd.f32 %v890_v13, %v721_v17  ;;  %v1060_v21 = vadd.f32 %v968_v15, %v126_v58 }
 0x110   :  { %v1191_v22 = vld [vmem:[#allocation2 + $0x160] sm:$0xff] }
 0x111   :  { %v1029_v23 = vadd.f32 %v891_v19, %v95_v16  ;;  %760 = vmatmul.bf16.gmra.mxu0 %v1467_v11  ;;  %v1255_v24 = vpack.c.bf16 %v1191_v22, %v1191_v22  ;;  %1125 = vst.msk [vmem:[#allocation2 + $0x168] sm:$0xff] %vm16_vm3, %v1060_v21  ;;  %840 = vmatmul.bf16.gmra.mxu2 %v1595_v18  ;;  %v131_v22 = vld [vmem:[#allocation2 + $0x190] sm:$0xff] }
 0x112   :  { %v1160_v26 = vld [vmem:[#allocation2 + $0x68] sm:$0xff]  ;;  %v980_v46 = vpop.f32.mrf.mxu3 }
 0x113   :  { %v1224_v27 = vpack.c.bf16 %v1160_v26, %v1160_v26  ;;  %1094 = vst.msk [vmem:[#allocation2 + $0x70] sm:$0xff] %vm16_vm3, %v1029_v23  ;;  %v100_v26 = vld [vmem:[#allocation2 + $0x98] sm:$0xff] }
 0x114   :  { %v897_v28 = vpop.f32.mrf.mxu1  ;;  %1320 = vst.msk [vmem:[%s2747_s2 + $0xb0] sm:$0xf] %vm1275_vm4, %v1255_v24  ;;  %v801_v29 = vpop.f32.mrf.mxu2 }
 0x115   :  { %1289 = vst.msk [vmem:[%s2747_s2 + $0x34] sm:$0xf] %vm1275_vm4, %v1224_v27  ;;  %v971_v30 = vadd.f32 %v2490_v41, %v801_v29  ;;  %v128_v41 = vld [vmem:[#allocation2 + $0x178] sm:$0xff] }
 0x116   :  { %v723_v32 = vpop.f32.mrf.mxu0 }
 0x117   :  { %v893_v13 = vadd.f32 %v892_v36, %v723_v32  ;;  %v1061_v33 = vadd.f32 %v971_v30, %v127_v12 }
 0x118   :  { %v1192_v34 = vld [vmem:[#allocation2 + $0x168] sm:$0xff] }
 0x119   :  { %v1030_v38 = vadd.f32 %v893_v13, %v96_v31  ;;  %v1256_v39 = vpack.c.bf16 %v1192_v34, %v1192_v34  ;;  %1126 = vst.msk [vmem:[#allocation2 + $0x170] sm:$0xff] %vm16_vm3, %v1061_v33  ;;  %v132_v34 = vld [vmem:[#allocation2 + $0x198] sm:$0xff] }
 0x11a   :  { %v1161_v40 = vld [vmem:[#allocation2 + $0x70] sm:$0xff]  ;;  %v982_v57 = vpop.f32.mrf.mxu3 }
 0x11b   :  { %v1225_v42 = vpack.c.bf16 %v1161_v40, %v1161_v40  ;;  %1095 = vst.msk [vmem:[#allocation2 + $0x78] sm:$0xff] %vm16_vm3, %v1030_v38  ;;  %v101_v40 = vld [vmem:[#allocation2 + $0xa0] sm:$0xff] }
 0x11c   :  { %v900_v43 = vpop.f32.mrf.mxu1  ;;  %1321 = vst.msk [vmem:[%s2747_s2 + $0xb4] sm:$0xf] %vm1275_vm4, %v1256_v39  ;;  %v803_v45 = vpop.f32.mrf.mxu2 }
 0x11d   :  { %1290 = vst.msk [vmem:[%s2747_s2 + $0x38] sm:$0xf] %vm1275_vm4, %v1225_v42  ;;  %v973_v47 = vadd.f32 %v2505_v56, %v803_v45  ;;  %v129_v56 = vld [vmem:[#allocation2 + $0x180] sm:$0xff] }
 0x11e   :  { %v726_v49 = vpop.f32.mrf.mxu0 }
 0x11f   :  { %v896_v50 = vadd.f32 %v895_v8, %v726_v49  ;;  %v1062_v51 = vadd.f32 %v973_v47, %v128_v41 }
 0x120   :  { %v1193_v52 = vld [vmem:[#allocation2 + $0x170] sm:$0xff] }
 0x121   :  { %v1031_v44 = vadd.f32 %v896_v50, %v97_v48  ;;  %v1257_v36 = vpack.c.bf16 %v1193_v52, %v1193_v52  ;;  %1127 = vst.msk [vmem:[#allocation2 + $0x178] sm:$0xff] %vm16_vm3, %v1062_v51  ;;  %v133_v52 = vld [vmem:[#allocation2 + $0x1a0] sm:$0xff] }
 0x122   :  { %v1162_v53 = vld [vmem:[#allocation2 + $0x78] sm:$0xff]  ;;  %v985_v11 = vpop.f32.mrf.mxu3 }
 0x123   :  { %v1226_v54 = vpack.c.bf16 %v1162_v53, %v1162_v53  ;;  %1096 = vst.msk [vmem:[#allocation2 + $0x80] sm:$0xff] %vm16_vm3, %v1031_v44  ;;  %v102_v53 = vld [vmem:[#allocation2 + $0xa8] sm:$0xff] }
 0x124   :  { %v902_v35 = vpop.f32.mrf.mxu1  ;;  %1322 = vst.msk [vmem:[%s2747_s2 + $0xb8] sm:$0xf] %vm1275_vm4, %v1257_v36  ;;  %v806_v55 = vpop.f32.mrf.mxu2 }
 0x125   :  { %1291 = vst.msk [vmem:[%s2747_s2 + $0x3c] sm:$0xf] %vm1275_vm4, %v1226_v54  ;;  %v976_v59 = vadd.f32 %v975_v14, %v806_v55 }
 0x126   :  { %v728_v37 = vpop.f32.mrf.mxu0 }
 0x127   :  { %v898_v63 = vadd.f32 %v897_v28, %v728_v37  ;;  %v1063_v0 = vadd.f32 %v976_v59, %v129_v56 }
 0x128   :  { %v1194_v1 = vld [vmem:[#allocation2 + $0x178] sm:$0xff] }
 0x129   :  { %v1032_v2 = vadd.f32 %v898_v63, %v98_v60  ;;  %v1258_v3 = vpack.c.bf16 %v1194_v1, %v1194_v1  ;;  %1128 = vst.msk [vmem:[#allocation2 + $0x180] sm:$0xff] %vm16_vm3, %v1063_v0  ;;  %v134_v0 = vld [vmem:[#allocation2 + $0x1a8] sm:$0xff] }
 0x12a   :  { %v1163_v4 = vld [vmem:[#allocation2 + $0x80] sm:$0xff]  ;;  %v987_v30 = vpop.f32.mrf.mxu3 }
 0x12b   :  { %v1227_v62 = vpack.c.bf16 %v1163_v4, %v1163_v4  ;;  %1097 = vst.msk [vmem:[#allocation2 + $0x88] sm:$0xff] %vm16_vm3, %v1032_v2  ;;  %v103_v4 = vld [vmem:[#allocation2 + $0xb0] sm:$0xff] }
 0x12c   :  { %v905_v6 = vpop.f32.mrf.mxu1  ;;  %1323 = vst.msk [vmem:[%s2747_s2 + $0xbc] sm:$0xf] %vm1275_vm4, %v1258_v3  ;;  %v808_v8 = vpop.f32.mrf.mxu2 }
 0x12d   :  { %1292 = vst.msk [vmem:[%s2747_s2 + $0x40] sm:$0xf] %vm1275_vm4, %v1227_v62  ;;  %v978_v10 = vadd.f32 %v977_v20, %v808_v8 }
 0x12e   :  { %v731_v58 = vpop.f32.mrf.mxu0 }
 0x12f   :  { %v901_v5 = vadd.f32 %v900_v43, %v731_v58  ;;  %v1064_v14 = vadd.f32 %v978_v10, %v130_v7 }
 0x130   :  { %v1195_v15 = vld [vmem:[#allocation2 + $0x180] sm:$0xff] }
 0x131   :  { %v1033_v16 = vadd.f32 %v901_v5, %v99_v61  ;;  %v1259_v17 = vpack.c.bf16 %v1195_v15, %v1195_v15  ;;  %1129 = vst.msk [vmem:[#allocation2 + $0x188] sm:$0xff] %vm16_vm3, %v1064_v14  ;;  %v135_v14 = vld [vmem:[#allocation2 + $0x1b0] sm:$0xff] }
 0x132   :  { %v1164_v18 = vld [vmem:[#allocation2 + $0x88] sm:$0xff]  ;;  %v990_v51 = vpop.f32.mrf.mxu3 }
 0x133   :  { %v1228_v19 = vpack.c.bf16 %v1164_v18, %v1164_v18  ;;  %1098 = vst.msk [vmem:[#allocation2 + $0x90] sm:$0xff] %vm16_vm3, %v1033_v16 }
 0x134   :  { %v907_v21 = vpop.f32.mrf.mxu1  ;;  %1324 = vst.msk [vmem:[%s2747_s2 + $0xc0] sm:$0xf] %vm1275_vm4, %v1259_v17  ;;  %v811_v23 = vpop.f32.mrf.mxu2  ;;  %v104_v17 = vld [vmem:[#allocation2 + $0xb8] sm:$0xff] }
 0x135   :  { %1293 = vst.msk [vmem:[%s2747_s2 + $0x44] sm:$0xf] %vm1275_vm4, %v1228_v19  ;;  %v981_v24 = vadd.f32 %v980_v46, %v811_v23 }
 0x136   :  { %v733_v27 = vpop.f32.mrf.mxu0 }
 0x137   :  { %v903_v28 = vadd.f32 %v902_v35, %v733_v27  ;;  %v1065_v12 = vadd.f32 %v981_v24, %v131_v22 }
 0x138   :  { %v1196_v29 = vld [vmem:[#allocation2 + $0x188] sm:$0xff] }
 0x139   :  { %v1034_v20 = vadd.f32 %v903_v28, %v100_v26  ;;  %v1260_v31 = vpack.c.bf16 %v1196_v29, %v1196_v29  ;;  %1130 = vst.msk [vmem:[#allocation2 + $0x190] sm:$0xff] %vm16_vm3, %v1065_v12  ;;  %v136_v29 = vld [vmem:[#allocation2 + $0x1b8] sm:$0xff] }
 0x13a   :  { %v1165_v32 = vld [vmem:[#allocation2 + $0x90] sm:$0xff]  ;;  %v992_v2 = vpop.f32.mrf.mxu3 }
 0x13b   :  { %v1229_v13 = vpack.c.bf16 %v1165_v32, %v1165_v32  ;;  %1099 = vst.msk [vmem:[#allocation2 + $0x98] sm:$0xff] %vm16_vm3, %v1034_v20 }
 0x13c   :  { %v910_v33 = vpop.f32.mrf.mxu1  ;;  %1325 = vst.msk [vmem:[%s2747_s2 + $0xc4] sm:$0xf] %vm1275_vm4, %v1260_v31  ;;  %v813_v38 = vpop.f32.mrf.mxu2  ;;  %v105_v31 = vld [vmem:[#allocation2 + $0xc0] sm:$0xff] }
 0x13d   :  { %1294 = vst.msk [vmem:[%s2747_s2 + $0x48] sm:$0xf] %vm1275_vm4, %v1229_v13  ;;  %v983_v39 = vadd.f32 %v982_v57, %v813_v38 }
 0x13e   :  { %v736_v42 = vpop.f32.mrf.mxu0 }
 0x13f   :  { %v906_v43 = vadd.f32 %v905_v6, %v736_v42  ;;  %v1066_v41 = vadd.f32 %v983_v39, %v132_v34 }
 0x140   :  { %v1197_v45 = vld [vmem:[#allocation2 + $0x190] sm:$0xff] }
 0x141   :  { %v1035_v46 = vadd.f32 %v906_v43, %v101_v40  ;;  %v1261_v47 = vpack.c.bf16 %v1197_v45, %v1197_v45  ;;  %1131 = vst.msk [vmem:[#allocation2 + $0x198] sm:$0xff] %vm16_vm3, %v1066_v41  ;;  %v137_v45 = vld [vmem:[#allocation2 + $0x1c0] sm:$0xff] }
 0x142   :  { %v1166_v48 = vld [vmem:[#allocation2 + $0x98] sm:$0xff] }
 0x143   :  { %v1230_v49 = vpack.c.bf16 %v1166_v48, %v1166_v48  ;;  %1100 = vst.msk [vmem:[#allocation2 + $0xa0] sm:$0xff] %vm16_vm3, %v1035_v46  ;;  %v106_v48 = vld [vmem:[#allocation2 + $0xc8] sm:$0xff] }
 0x144   :  { %v912_v50 = vpop.f32.mrf.mxu1  ;;  %1326 = vst.msk [vmem:[%s2747_s2 + $0xc8] sm:$0xf] %vm1275_vm4, %v1261_v47  ;;  %v816_v44 = vpop.f32.mrf.mxu2 }
 0x145   :  { %1295 = vst.msk [vmem:[%s2747_s2 + $0x4c] sm:$0xf] %vm1275_vm4, %v1230_v49  ;;  %v986_v36 = vadd.f32 %v985_v11, %v816_v44 }
 0x146   :  { %v738_v54 = vpop.f32.mrf.mxu0 }
 0x147   :  { %v908_v35 = vadd.f32 %v907_v21, %v738_v54  ;;  %v1067_v56 = vadd.f32 %v986_v36, %v133_v52  ;;  %v995_v21 = vpop.f32.mrf.mxu3 }
 0x148   :  { %v1198_v55 = vld [vmem:[#allocation2 + $0x198] sm:$0xff] }
 0x149   :  { %v1036_v57 = vadd.f32 %v908_v35, %v102_v53  ;;  %v1262_v59 = vpack.c.bf16 %v1198_v55, %v1198_v55  ;;  %1132 = vst.msk [vmem:[#allocation2 + $0x1a0] sm:$0xff] %vm16_vm3, %v1067_v56  ;;  %v138_v55 = vld [vmem:[#allocation2 + $0x1c8] sm:$0xff] }
 0x14a   :  { %v1167_v60 = vld [vmem:[#allocation2 + $0xa0] sm:$0xff] }
 0x14b   :  { %v1231_v37 = vpack.c.bf16 %v1167_v60, %v1167_v60  ;;  %1101 = vst.msk [vmem:[#allocation2 + $0xa8] sm:$0xff] %vm16_vm3, %v1036_v57  ;;  %v107_v60 = vld [vmem:[#allocation2 + $0xd0] sm:$0xff] }
 0x14c   :  { %v915_v63 = vpop.f32.mrf.mxu1  ;;  %1327 = vst.msk [vmem:[%s2747_s2 + $0xcc] sm:$0xf] %vm1275_vm4, %v1262_v59  ;;  %v818_v1 = vpop.f32.mrf.mxu2 }
 0x14d   :  { %1296 = vst.msk [vmem:[%s2747_s2 + $0x50] sm:$0xf] %vm1275_vm4, %v1231_v37  ;;  %v988_v3 = vadd.f32 %v987_v30, %v818_v1 }
 0x14e   :  { %v741_v62 = vpop.f32.mrf.mxu0 }
 0x14f   :  { %v911_v6 = vadd.f32 %v910_v33, %v741_v62  ;;  %v1068_v7 = vadd.f32 %v988_v3, %v134_v0  ;;  %v997_v39 = vpop.f32.mrf.mxu3 }
 0x150   :  { %v1199_v8 = vld [vmem:[#allocation2 + $0x1a0] sm:$0xff] }
 0x151   :  { %v1037_v10 = vadd.f32 %v911_v6, %v103_v4  ;;  %v1263_v61 = vpack.c.bf16 %v1199_v8, %v1199_v8  ;;  %1133 = vst.msk [vmem:[#allocation2 + $0x1a8] sm:$0xff] %vm16_vm3, %v1068_v7  ;;  %v139_v7 = vld [vmem:[#allocation2 + $0x1d0] sm:$0xff] }
 0x152   :  { %v1168_v58 = vld [vmem:[#allocation2 + $0xa8] sm:$0xff] }
 0x153   :  { %v1232_v5 = vpack.c.bf16 %v1168_v58, %v1168_v58  ;;  %1102 = vst.msk [vmem:[#allocation2 + $0xb0] sm:$0xff] %vm16_vm3, %v1037_v10  ;;  %v108_v58 = vld [vmem:[#allocation2 + $0xd8] sm:$0xff] }
 0x154   :  { %v917_v11 = vpop.f32.mrf.mxu1  ;;  %1328 = vst.msk [vmem:[%s2747_s2 + $0xd0] sm:$0xf] %vm1275_vm4, %v1263_v61  ;;  %v821_v15 = vpop.f32.mrf.mxu2 }
 0x155   :  { %1297 = vst.msk [vmem:[%s2747_s2 + $0x54] sm:$0xf] %vm1275_vm4, %v1232_v5  ;;  %v991_v16 = vadd.f32 %v990_v51, %v821_v15 }
 0x156   :  { %v743_v18 = vpop.f32.mrf.mxu0 }
 0x157   :  { %v913_v19 = vadd.f32 %v912_v50, %v743_v18  ;;  %v1069_v22 = vadd.f32 %v991_v16, %v135_v14  ;;  %v1000_v56 = vpop.f32.mrf.mxu3 }
 0x158   :  { %v1200_v23 = vld [vmem:[#allocation2 + $0x1a8] sm:$0xff] }
 0x159   :  { %v1038_v24 = vadd.f32 %v913_v19, %v104_v17  ;;  %v1264_v26 = vpack.c.bf16 %v1200_v23, %v1200_v23  ;;  %1134 = vst.msk [vmem:[#allocation2 + $0x1b0] sm:$0xff] %vm16_vm3, %v1069_v22  ;;  %v140_v22 = vld [vmem:[#allocation2 + $0x1d8] sm:$0xff] }
 0x15a   :  { %v1169_v27 = vld [vmem:[#allocation2 + $0xb0] sm:$0xff] }
 0x15b   :  { %v1233_v28 = vpack.c.bf16 %v1169_v27, %v1169_v27  ;;  %1103 = vst.msk [vmem:[#allocation2 + $0xb8] sm:$0xff] %vm16_vm3, %v1038_v24 }
 0x15c   :  { %v920_v12 = vpop.f32.mrf.mxu1  ;;  %1329 = vst.msk [vmem:[%s2747_s2 + $0xd4] sm:$0xf] %vm1275_vm4, %v1264_v26  ;;  %v823_v20 = vpop.f32.mrf.mxu2  ;;  %v109_v26 = vld [vmem:[#allocation2 + $0xe0] sm:$0xff] }
 0x15d   :  { %1298 = vst.msk [vmem:[%s2747_s2 + $0x58] sm:$0xf] %vm1275_vm4, %v1233_v28  ;;  %v993_v30 = vadd.f32 %v992_v2, %v823_v20 }
 0x15e   :  { %v746_v32 = vpop.f32.mrf.mxu0 }
 0x15f   :  { %v916_v13 = vadd.f32 %v915_v63, %v746_v32  ;;  %v1070_v33 = vadd.f32 %v993_v30, %v136_v29  ;;  %v1002_v10 = vpop.f32.mrf.mxu3 }
 0x160   :  { %v1201_v34 = vld [vmem:[#allocation2 + $0x1b0] sm:$0xff] }
 0x161   :  { %v1039_v38 = vadd.f32 %v916_v13, %v105_v31  ;;  %v1265_v40 = vpack.c.bf16 %v1201_v34, %v1201_v34  ;;  %1135 = vst.msk [vmem:[#allocation2 + $0x1b8] sm:$0xff] %vm16_vm3, %v1070_v33  ;;  %v141_v34 = vld [vmem:[#allocation2 + $0x1e0] sm:$0xff] }
 0x162   :  { %v1170_v42 = vld [vmem:[#allocation2 + $0xb8] sm:$0xff] }
 0x163   :  { %v1234_v43 = vpack.c.bf16 %v1170_v42, %v1170_v42  ;;  %1104 = vst.msk [vmem:[#allocation2 + $0xc0] sm:$0xff] %vm16_vm3, %v1039_v38 }
 0x164   :  { %v922_v41 = vpop.f32.mrf.mxu1  ;;  %1330 = vst.msk [vmem:[%s2747_s2 + $0xd8] sm:$0xf] %vm1275_vm4, %v1265_v40  ;;  %v826_v46 = vpop.f32.mrf.mxu2  ;;  %v110_v40 = vld [vmem:[#allocation2 + $0xe8] sm:$0xff] }
 0x165   :  { %1299 = vst.msk [vmem:[%s2747_s2 + $0x5c] sm:$0xf] %vm1275_vm4, %v1234_v43  ;;  %v996_v47 = vadd.f32 %v995_v21, %v826_v46 }
 0x166   :  { %v748_v49 = vpop.f32.mrf.mxu0 }
 0x167   :  { %v918_v50 = vadd.f32 %v917_v11, %v748_v49  ;;  %v1071_v51 = vadd.f32 %v996_v47, %v137_v45  ;;  %v1005_v28 = vpop.f32.mrf.mxu3 }
 0x168   :  { %v1202_v52 = vld [vmem:[#allocation2 + $0x1b8] sm:$0xff] }
 0x169   :  { %v1040_v44 = vadd.f32 %v918_v50, %v106_v48  ;;  %v1266_v36 = vpack.c.bf16 %v1202_v52, %v1202_v52  ;;  %1136 = vst.msk [vmem:[#allocation2 + $0x1c0] sm:$0xff] %vm16_vm3, %v1071_v51  ;;  %v113_v51 = vld [vmem:[#allocation2 + $0x100] sm:$0xff] }
 0x16a   :  { %v1171_v53 = vld [vmem:[#allocation2 + $0xc0] sm:$0xff] }
 0x16b   :  { %v1235_v54 = vpack.c.bf16 %v1171_v53, %v1171_v53  ;;  %1105 = vst.msk [vmem:[#allocation2 + $0xc8] sm:$0xff] %vm16_vm3, %v1040_v44 }
 0x16c   :  { %v925_v35 = vpop.f32.mrf.mxu1  ;;  %1331 = vst.msk [vmem:[%s2747_s2 + $0xdc] sm:$0xf] %vm1275_vm4, %v1266_v36  ;;  %v828_v57 = vpop.f32.mrf.mxu2  ;;  %v142_v36 = vld [vmem:[#allocation2 + $0x1e8] sm:$0xff] }
 0x16d   :  { %1300 = vst.msk [vmem:[%s2747_s2 + $0x60] sm:$0xf] %vm1275_vm4, %v1235_v54  ;;  %v998_v59 = vadd.f32 %v997_v39, %v828_v57 }
 0x16e   :  { %v751_v37 = vpop.f32.mrf.mxu0 }
 0x16f   :  { %v921_v63 = vadd.f32 %v920_v12, %v751_v37  ;;  %v1072_v0 = vadd.f32 %v998_v59, %v138_v55  ;;  %v1007_v46 = vpop.f32.mrf.mxu3 }
 0x170   :  { %v1203_v1 = vld [vmem:[#allocation2 + $0x1c0] sm:$0xff] }
 0x171   :  { %v1041_v2 = vadd.f32 %v921_v63, %v107_v60  ;;  %v1267_v3 = vpack.c.bf16 %v1203_v1, %v1203_v1  ;;  %1137 = vst.msk [vmem:[#allocation2 + $0x1c8] sm:$0xff] %vm16_vm3, %v1072_v0 }
 0x172   :  { %v1172_v4 = vld [vmem:[#allocation2 + $0xc8] sm:$0xff] }
 0x173   :  { %v1236_v62 = vpack.c.bf16 %v1172_v4, %v1172_v4  ;;  %1106 = vst.msk [vmem:[#allocation2 + $0xd0] sm:$0xff] %vm16_vm3, %v1041_v2  ;;  %v114_v2 = vld [vmem:[#allocation2 + $0x108] sm:$0xff] }
 0x174   :  { %v927_v6 = vpop.f32.mrf.mxu1  ;;  %1332 = vst.msk [vmem:[%s2747_s2 + $0xe0] sm:$0xf] %vm1275_vm4, %v1267_v3  ;;  %v831_v8 = vpop.f32.mrf.mxu2 }
 0x175   :  { %1301 = vst.msk [vmem:[%s2747_s2 + $0x64] sm:$0xf] %vm1275_vm4, %v1236_v62  ;;  %v1001_v61 = vadd.f32 %v1000_v56, %v831_v8  ;;  %v111_v56 = vld [vmem:[#allocation2 + $0xf0] sm:$0xff] }
 0x176   :  { %v753_v5 = vpop.f32.mrf.mxu0  ;;  %v143_v62 = vld [vmem:[#allocation2 + $0x1f0] sm:$0xff] }
 0x177   :  { %v923_v11 = vadd.f32 %v922_v41, %v753_v5  ;;  %v1073_v14 = vadd.f32 %v1001_v61, %v139_v7  ;;  %v1010_v1 = vpop.f32.mrf.mxu3 }
 0x178   :  { %v1204_v15 = vld [vmem:[#allocation2 + $0x1c8] sm:$0xff] }
 0x179   :  { %v1042_v16 = vadd.f32 %v923_v11, %v108_v58  ;;  %v1268_v17 = vpack.c.bf16 %v1204_v15, %v1204_v15  ;;  %1138 = vst.msk [vmem:[#allocation2 + $0x1d0] sm:$0xff] %vm16_vm3, %v1073_v14  ;;  %v112_v58 = vld [vmem:[#allocation2 + $0xf8] sm:$0xff] }
 0x17a   :  { %v1173_v18 = vld [vmem:[#allocation2 + $0xd0] sm:$0xff] }
 0x17b   :  { %v1237_v19 = vpack.c.bf16 %v1173_v18, %v1173_v18  ;;  %1107 = vst.msk [vmem:[#allocation2 + $0xd8] sm:$0xff] %vm16_vm3, %v1042_v16 }
 0x17c   :  { %v930_v21 = vpop.f32.mrf.mxu1  ;;  %1333 = vst.msk [vmem:[%s2747_s2 + $0xe4] sm:$0xf] %vm1275_vm4, %v1268_v17  ;;  %v833_v23 = vpop.f32.mrf.mxu2 }
 0x17d   :  { %1302 = vst.msk [vmem:[%s2747_s2 + $0x68] sm:$0xf] %vm1275_vm4, %v1237_v19  ;;  %v1003_v24 = vadd.f32 %v1002_v10, %v833_v23 }
 0x17e   :  { %v756_v27 = vpop.f32.mrf.mxu0 }
 0x17f   :  { %v926_v12 = vadd.f32 %v925_v35, %v756_v27  ;;  %v1074_v29 = vadd.f32 %v1003_v24, %v140_v22  ;;  %v1012_v19 = vpop.f32.mrf.mxu3 }
 0x180   :  { %v1205_v20 = vld [vmem:[#allocation2 + $0x1d0] sm:$0xff] }
 0x181   :  { %v1043_v30 = vadd.f32 %v926_v12, %v109_v26  ;;  %v1269_v31 = vpack.c.bf16 %v1205_v20, %v1205_v20  ;;  %1139 = vst.msk [vmem:[#allocation2 + $0x1d8] sm:$0xff] %vm16_vm3, %v1074_v29 }
 0x182   :  { %v1174_v32 = vld [vmem:[#allocation2 + $0xd8] sm:$0xff] }
 0x183   :  { %v1238_v13 = vpack.c.bf16 %v1174_v32, %v1174_v32  ;;  %1108 = vst.msk [vmem:[#allocation2 + $0xe0] sm:$0xff] %vm16_vm3, %v1043_v30 }
 0x184   :  { %v932_v33 = vpop.f32.mrf.mxu1  ;;  %1334 = vst.msk [vmem:[%s2747_s2 + $0xe8] sm:$0xf] %vm1275_vm4, %v1269_v31  ;;  %v836_v38 = vpop.f32.mrf.mxu2 }
 0x185   :  { %1303 = vst.msk [vmem:[%s2747_s2 + $0x6c] sm:$0xf] %vm1275_vm4, %v1238_v13  ;;  %v1006_v39 = vadd.f32 %v1005_v28, %v836_v38 }
 0x186   :  { %v758_v42 = vpop.f32.mrf.mxu0 }
 0x187   :  { %v928_v43 = vadd.f32 %v927_v6, %v758_v42  ;;  %v1075_v41 = vadd.f32 %v1006_v39, %v141_v34 }
 0x188   :  { %v1206_v45 = vld [vmem:[#allocation2 + $0x1d8] sm:$0xff] }
 0x189   :  { %v1044_v47 = vadd.f32 %v928_v43, %v110_v40  ;;  %v1270_v48 = vpack.c.bf16 %v1206_v45, %v1206_v45  ;;  %1140 = vst.msk [vmem:[#allocation2 + $0x1e0] sm:$0xff] %vm16_vm3, %v1075_v41 }
 0x18a   :  { %v1175_v49 = vld [vmem:[#allocation2 + $0xe0] sm:$0xff] }
 0x18b   :  { %v1239_v50 = vpack.c.bf16 %v1175_v49, %v1175_v49  ;;  %1109 = vst.msk [vmem:[#allocation2 + $0xe8] sm:$0xff] %vm16_vm3, %v1044_v47 }
 0x18c   :  { %v935_v52 = vpop.f32.mrf.mxu1  ;;  %1335 = vst.msk [vmem:[%s2747_s2 + $0xec] sm:$0xf] %vm1275_vm4, %v1270_v48  ;;  %v838_v53 = vpop.f32.mrf.mxu2 }
 0x18d   :  { %v936_v44 = vadd.f32 %v935_v52, %v2134_v9  ;;  %1304 = vst.msk [vmem:[%s2747_s2 + $0x70] sm:$0xf] %vm1275_vm4, %v1239_v50  ;;  %v1008_v35 = vadd.f32 %v1007_v46, %v838_v53 }
 0x18e   :  { %v761_v55 = vpop.f32.mrf.mxu0 }
 0x18f   :  { %v1047_v54 = vadd.f32 %v936_v44, %v113_v51  ;;  %v931_v57 = vadd.f32 %v930_v21, %v761_v55  ;;  %v1076_v59 = vadd.f32 %v1008_v35, %v142_v36  ;;  %v144_v21 = vld [vmem:[#allocation2 + $0x1f8] sm:$0xff] }
 0x190   :  { %v1207_v60 = vld [vmem:[#allocation2 + $0x1e0] sm:$0xff] }
 0x191   :  { %1112 = vst.msk [vmem:[#allocation2 + $0x100] sm:$0xff] %vm16_vm3, %v1047_v54  ;;  %v1045_v37 = vadd.f32 %v931_v57, %v111_v56  ;;  %v1271_v63 = vpack.c.bf16 %v1207_v60, %v1207_v60 }
 0x192   :  { %v1176_v0 = vld [vmem:[#allocation2 + $0xe8] sm:$0xff]  ;;  %1141 = vst.msk [vmem:[#allocation2 + $0x1e8] sm:$0xff] %vm16_vm3, %v1076_v59 }
 0x193   :  { %v1240_v9 = vpack.c.bf16 %v1176_v0, %v1176_v0  ;;  %1110 = vst.msk [vmem:[#allocation2 + $0xf0] sm:$0xff] %vm16_vm3, %v1045_v37 }
 0x194   :  { %v937_v3 = vpop.f32.mrf.mxu1  ;;  %1336 = vst.msk [vmem:[%s2747_s2 + $0xf0] sm:$0xf] %vm1275_vm4, %v1271_v63  ;;  %v841_v6 = vpop.f32.mrf.mxu2 }
 0x195   :  { %v938_v4 = vadd.f32 %v937_v3, %v2183_v25  ;;  %1305 = vst.msk [vmem:[%s2747_s2 + $0x74] sm:$0xf] %vm1275_vm4, %v1240_v9  ;;  %v1011_v8 = vadd.f32 %v1010_v1, %v841_v6 }
 0x196   :  { %v763_v10 = vpop.f32.mrf.mxu0 }
 0x197   :  { %v1048_v7 = vadd.f32 %v938_v4, %v114_v2  ;;  %v933_v5 = vadd.f32 %v932_v33, %v763_v10  ;;  %v1077_v14 = vadd.f32 %v1011_v8, %v143_v62 }
 0x198   :  { %v1179_v61 = vld [vmem:[#allocation2 + $0x100] sm:$0xff] }
 0x199   :  { %v1243_v11 = vpack.c.bf16 %v1179_v61, %v1179_v61  ;;  %1113 = vst.msk [vmem:[#allocation2 + $0x108] sm:$0xff] %vm16_vm3, %v1048_v7  ;;  %v1208_v15 = vld [vmem:[#allocation2 + $0x1e8] sm:$0xff]  ;;  %v1046_v17 = vadd.f32 %v933_v5, %v112_v58 }
 0x19a   :  { %v1272_v25 = vpack.c.bf16 %v1208_v15, %v1208_v15  ;;  %v1177_v16 = vld [vmem:[#allocation2 + $0xf0] sm:$0xff]  ;;  %1142 = vst.msk [vmem:[#allocation2 + $0x1f0] sm:$0xff] %vm16_vm3, %v1077_v14 }
 0x19b   :  { %1308 = vst.msk [vmem:[%s2747_s2 + $0x80] sm:$0xf] %vm1275_vm4, %v1243_v11  ;;  %v1241_v18 = vpack.c.bf16 %v1177_v16, %v1177_v16 }
 0x19c   :  { %1337 = vst.msk [vmem:[%s2747_s2 + $0xf4] sm:$0xf] %vm1275_vm4, %v1272_v25  ;;  %v843_v22 = vpop.f32.mrf.mxu2 }
 0x19d   :  { %1306 = vst.msk [vmem:[%s2747_s2 + $0x78] sm:$0xf] %vm1275_vm4, %v1241_v18  ;;  %v1013_v23 = vadd.f32 %v1012_v19, %v843_v22 }
 0x19e   :  { %1111 = vst.msk [vmem:[#allocation2 + $0xf8] sm:$0xff] %vm16_vm3, %v1046_v17 }
 0x19f   :  { %v1078_v27 = vadd.f32 %v1013_v23, %v144_v21 }
 0x1a0   :  { %v1180_v24 = vld [vmem:[#allocation2 + $0x108] sm:$0xff] }
 0x1a1   :  { %v1244_v26 = vpack.c.bf16 %v1180_v24, %v1180_v24  ;;  %v1209_v28 = vld [vmem:[#allocation2 + $0x1f0] sm:$0xff]  ;;  %1143 = vst.msk [vmem:[#allocation2 + $0x1f8] sm:$0xff] %vm16_vm3, %v1078_v27 }
 0x1a2   :  { %v1273_v12 = vpack.c.bf16 %v1209_v28, %v1209_v28 }
 0x1a3   :  { %1309 = vst.msk [vmem:[%s2747_s2 + $0x84] sm:$0xf] %vm1275_vm4, %v1244_v26 }
 0x1a4   :  { %1338 = vst.msk [vmem:[%s2747_s2 + $0xf8] sm:$0xf] %vm1275_vm4, %v1273_v12 }
 0x1a5   :  { %v1178_v29 = vld [vmem:[#allocation2 + $0xf8] sm:$0xff] }
 0x1a6   :  { %v1242_v20 = vpack.c.bf16 %v1178_v29, %v1178_v29 }
 0x1a8   :  { %1307 = vst.msk [vmem:[%s2747_s2 + $0x7c] sm:$0xf] %vm1275_vm4, %v1242_v20  ;;  %v1210_v30 = vld [vmem:[#allocation2 + $0x1f8] sm:$0xff] }
 0x1a9   :  { %v1274_v31 = vpack.c.bf16 %v1210_v30, %v1210_v30 }
 0x1ab   :  { %1339 = vst.msk [vmem:[%s2747_s2 + $0xfc] sm:$0xf] %vm1275_vm4, %v1274_v31 }

</bundles_post_ra>
